<compile_context>
chip_gen: v6e
topology: v6e:2x2x1
jax: 0.10.0
libtpu: 0.0.40
codegen_flags: <defaults>
</compile_context>

<pallas_src>
import jax
import jax.numpy as jnp
from jax import lax
from jax.experimental import pallas as pl
from jax.experimental.pallas import tpu as pltpu


def _pairwise_mlp_kernel(f_ref, w1_ref, b1_ref, w2_ref, b2_ref, cm_ref, scores_ref):
    N, D = f_ref.shape          # (num_tensors, tensor_size)
    H = b1_ref.shape[-1]        # hidden_dim

    f = f_ref[...]              # (N, D) f32 — needed for the matmul anyway

    # ---- concatenated_matrix: written directly from f, no (N*N, D) intermediates.
    # Row r = i*N + j holds [f[i], f[j]]. Column slices are 512-wide (128-aligned),
    # row offsets are multiples of N=8 -> unmasked, lane-dense stores.
    for i in range(N):
        cm_ref[i * N:(i + 1) * N, :D] = jnp.broadcast_to(
            f[i:i + 1, :], (N, D)).astype(cm_ref.dtype)
        cm_ref[i * N:(i + 1) * N, D:] = f.astype(cm_ref.dtype)

    # ---- fc1 factored out of the pairwise expansion:
    # one (N, D) x (D, 2H) MXU pass; columns [:H] are f@w1a ("i" half),
    # columns [H:] are f@w1b ("j" half).
    ab = jnp.dot(f, w1_ref[...], preferred_element_type=jnp.float32)   # (N, 2H)
    a = ab[:, :H] + b1_ref[...]     # fc1 bias folded in once
    b = ab[:, H:]

    w2_row = w2_ref[...]            # (1, H)
    b2 = b2_ref[0]                  # scalar fc2 bias from SMEM

    # ---- fc2 on the VPU: per-column lane reduction, assembled directly in
    # (N, N) layout (col_j[i] = sum_h relu(a[i,h] + b[j,h]) * w2[h] + b2).
    row = lax.broadcasted_iota(jnp.int32, (N, N), 0)
    col = lax.broadcasted_iota(jnp.int32, (N, N), 1)
    s = jnp.zeros((N, N), jnp.float32)
    for j in range(N):
        h_j = jnp.maximum(a + b[j:j + 1, :], 0.0)                       # (N, H)
        col_j = jnp.sum(h_j * w2_row, axis=-1, keepdims=True) + b2      # (N, 1) = scores[:, j]
        s = jnp.where(col == j, jnp.broadcast_to(col_j, (N, N)), s)

    # attention_scores[diag] = 1
    scores_ref[...] = jnp.where(row == col, 1.0, s).astype(scores_ref.dtype)


def pairwise_concat_and_score(f, w1, b1, w2, b2):
    """f: (N, D);  w1: (2D, H) stored (in, out);  b1: (H,);  w2: (H, 1);  b2: (1,)."""
    N, D = f.shape
    H = w1.shape[1]

    # Fuse the two 512-wide halves of fc1 into a single (D, 2H) operand so the
    # kernel runs one lane-dense MXU pass.
    w1_fused = jnp.concatenate([w1[:D], w1[D:]], axis=1)    # (D, 2H)
    b1_2d = b1.reshape(1, H)
    w2_row = w2.reshape(1, H)
    b2_1d = b2.reshape(1)

    vmem = pl.BlockSpec(memory_space=pltpu.MemorySpace.VMEM)
    smem = pl.BlockSpec(memory_space=pltpu.MemorySpace.SMEM)
    cm, scores = pl.pallas_call(
        _pairwise_mlp_kernel,
        out_shape=(jax.ShapeDtypeStruct((N * N, 2 * D), jnp.float32),
                   jax.ShapeDtypeStruct((N, N), jnp.float32)),
        in_specs=[vmem, vmem, vmem, vmem, smem],
        out_specs=(vmem, vmem),
    )(f, w1_fused, b1_2d, w2_row, b2_1d)
    return cm, scores


def _reference(f, w1, b1, w2, b2):
    N, D = f.shape
    e1 = jnp.broadcast_to(f[:, None, :], (N, N, D)).reshape(N * N, D)
    e2 = jnp.broadcast_to(f[None, :, :], (N, N, D)).reshape(N * N, D)
    cm = jnp.concatenate([e1, e2], axis=-1)
    h = jnp.maximum(cm @ w1 + b1, 0.0)
    s = (h @ w2 + b2).reshape(N, N)
    s = jnp.where(jnp.eye(N, dtype=bool), 1.0, s)
    return cm, s


if __name__ == "__main__":
    # Model fixes input_dim = 1024 => tensor_size = 512. Keep num_tensors small.
    N = 8              # num_tensors
    D = 512            # tensor_size
    H = 512            # hidden_dim
    key = jax.random.PRNGKey(0)
    kf, k1, k2, k3, k4 = jax.random.split(key, 5)

    f = jax.random.normal(kf, (N, D), dtype=jnp.float32)

    # Deterministic "nn.Linear"-like init (weights stored as (in, out) for JAX).
    w1 = jax.random.uniform(k1, (2 * D, H), jnp.float32, -1.0, 1.0) / jnp.sqrt(2.0 * D)
    b1 = jax.random.uniform(k2, (H,), jnp.float32, -1.0, 1.0) / jnp.sqrt(2.0 * D)
    w2 = jax.random.uniform(k3, (H, 1), jnp.float32, -1.0, 1.0) / jnp.sqrt(1.0 * H)
    b2 = jax.random.uniform(k4, (1,), jnp.float32, -1.0, 1.0) / jnp.sqrt(1.0 * H)

    cm, scores = pairwise_concat_and_score(f, w1, b1, w2, b2)
    jax.block_until_ready((cm, scores))

    cm_ref, scores_ref = _reference(f, w1, b1, w2, b2)
    assert jnp.allclose(cm, cm_ref, atol=1e-5), "concatenated_matrix mismatch"
    assert jnp.allclose(scores, scores_ref, rtol=1e-4, atol=1e-3), "attention_scores mismatch"

    print("KERNEL_OK")
</pallas_src>

<mosaic_0001>
module attributes {stable_mosaic.version = 11 : i64} {
  func.func @_pairwise_mlp_kernel(%arg0: memref<8x512xf32, #tpu.memory_space<vmem>>, %arg1: memref<512x1024xf32, #tpu.memory_space<vmem>>, %arg2: memref<1x512xf32, #tpu.memory_space<vmem>>, %arg3: memref<1x512xf32, #tpu.memory_space<vmem>>, %arg4: memref<1xf32, #tpu.memory_space<smem>>, %arg5: memref<64x1024xf32, #tpu.memory_space<vmem>>, %arg6: memref<8x8xf32, #tpu.memory_space<vmem>>) attributes {dimension_semantics = [], scalar_prefetch = 0 : i64, scratch_operands = 0 : i64, tpu.core_type = #tpu.core_type<tc>} {
    %c0 = arith.constant 0 : index
    %c0_0 = arith.constant 0 : index
    %0 = vector.load %arg0[%c0, %c0_0] : memref<8x512xf32, #tpu.memory_space<vmem>>, vector<8x512xf32>
    %1 = vector.extract_strided_slice %0 {offsets = [0, 0], sizes = [1, 512], strides = [1, 1]} : vector<8x512xf32> to vector<1x512xf32>
    %2 = vector.shape_cast %1 : vector<1x512xf32> to vector<1x512xf32>
    %3 = vector.broadcast %2 : vector<1x512xf32> to vector<8x512xf32>
    %c0_1 = arith.constant 0 : index
    %c0_2 = arith.constant 0 : index
    %4 = vector.load %arg5[%c0_1, %c0_2] : memref<64x1024xf32, #tpu.memory_space<vmem>>, vector<8x512xf32>
    tpu.vector_store %arg5[%c0_1, %c0_2], %3 {strides = array<i32>} : memref<64x1024xf32, #tpu.memory_space<vmem>>, vector<8x512xf32>,
    %c0_3 = arith.constant 0 : index
    %c512 = arith.constant 512 : index
    %5 = vector.load %arg5[%c0_3, %c512] : memref<64x1024xf32, #tpu.memory_space<vmem>>, vector<8x512xf32>
    tpu.vector_store %arg5[%c0_3, %c512], %0 {strides = array<i32>} : memref<64x1024xf32, #tpu.memory_space<vmem>>, vector<8x512xf32>,
    %6 = vector.extract_strided_slice %0 {offsets = [1, 0], sizes = [1, 512], strides = [1, 1]} : vector<8x512xf32> to vector<1x512xf32>
    %7 = vector.shape_cast %6 : vector<1x512xf32> to vector<1x512xf32>
    %8 = vector.broadcast %7 : vector<1x512xf32> to vector<8x512xf32>
    %c8 = arith.constant 8 : index
    %c0_4 = arith.constant 0 : index
    %9 = vector.load %arg5[%c8, %c0_4] : memref<64x1024xf32, #tpu.memory_space<vmem>>, vector<8x512xf32>
    tpu.vector_store %arg5[%c8, %c0_4], %8 {strides = array<i32>} : memref<64x1024xf32, #tpu.memory_space<vmem>>, vector<8x512xf32>,
    %c8_5 = arith.constant 8 : index
    %c512_6 = arith.constant 512 : index
    %10 = vector.load %arg5[%c8_5, %c512_6] : memref<64x1024xf32, #tpu.memory_space<vmem>>, vector<8x512xf32>
    tpu.vector_store %arg5[%c8_5, %c512_6], %0 {strides = array<i32>} : memref<64x1024xf32, #tpu.memory_space<vmem>>, vector<8x512xf32>,
    %11 = vector.extract_strided_slice %0 {offsets = [2, 0], sizes = [1, 512], strides = [1, 1]} : vector<8x512xf32> to vector<1x512xf32>
    %12 = vector.shape_cast %11 : vector<1x512xf32> to vector<1x512xf32>
    %13 = vector.broadcast %12 : vector<1x512xf32> to vector<8x512xf32>
    %c16 = arith.constant 16 : index
    %c0_7 = arith.constant 0 : index
    %14 = vector.load %arg5[%c16, %c0_7] : memref<64x1024xf32, #tpu.memory_space<vmem>>, vector<8x512xf32>
    tpu.vector_store %arg5[%c16, %c0_7], %13 {strides = array<i32>} : memref<64x1024xf32, #tpu.memory_space<vmem>>, vector<8x512xf32>,
    %c16_8 = arith.constant 16 : index
    %c512_9 = arith.constant 512 : index
    %15 = vector.load %arg5[%c16_8, %c512_9] : memref<64x1024xf32, #tpu.memory_space<vmem>>, vector<8x512xf32>
    tpu.vector_store %arg5[%c16_8, %c512_9], %0 {strides = array<i32>} : memref<64x1024xf32, #tpu.memory_space<vmem>>, vector<8x512xf32>,
    %16 = vector.extract_strided_slice %0 {offsets = [3, 0], sizes = [1, 512], strides = [1, 1]} : vector<8x512xf32> to vector<1x512xf32>
    %17 = vector.shape_cast %16 : vector<1x512xf32> to vector<1x512xf32>
    %18 = vector.broadcast %17 : vector<1x512xf32> to vector<8x512xf32>
    %c24 = arith.constant 24 : index
    %c0_10 = arith.constant 0 : index
    %19 = vector.load %arg5[%c24, %c0_10] : memref<64x1024xf32, #tpu.memory_space<vmem>>, vector<8x512xf32>
    tpu.vector_store %arg5[%c24, %c0_10], %18 {strides = array<i32>} : memref<64x1024xf32, #tpu.memory_space<vmem>>, vector<8x512xf32>,
    %c24_11 = arith.constant 24 : index
    %c512_12 = arith.constant 512 : index
    %20 = vector.load %arg5[%c24_11, %c512_12] : memref<64x1024xf32, #tpu.memory_space<vmem>>, vector<8x512xf32>
    tpu.vector_store %arg5[%c24_11, %c512_12], %0 {strides = array<i32>} : memref<64x1024xf32, #tpu.memory_space<vmem>>, vector<8x512xf32>,
    %21 = vector.extract_strided_slice %0 {offsets = [4, 0], sizes = [1, 512], strides = [1, 1]} : vector<8x512xf32> to vector<1x512xf32>
    %22 = vector.shape_cast %21 : vector<1x512xf32> to vector<1x512xf32>
    %23 = vector.broadcast %22 : vector<1x512xf32> to vector<8x512xf32>
    %c32 = arith.constant 32 : index
    %c0_13 = arith.constant 0 : index
    %24 = vector.load %arg5[%c32, %c0_13] : memref<64x1024xf32, #tpu.memory_space<vmem>>, vector<8x512xf32>
    tpu.vector_store %arg5[%c32, %c0_13], %23 {strides = array<i32>} : memref<64x1024xf32, #tpu.memory_space<vmem>>, vector<8x512xf32>,
    %c32_14 = arith.constant 32 : index
    %c512_15 = arith.constant 512 : index
    %25 = vector.load %arg5[%c32_14, %c512_15] : memref<64x1024xf32, #tpu.memory_space<vmem>>, vector<8x512xf32>
    tpu.vector_store %arg5[%c32_14, %c512_15], %0 {strides = array<i32>} : memref<64x1024xf32, #tpu.memory_space<vmem>>, vector<8x512xf32>,
    %26 = vector.extract_strided_slice %0 {offsets = [5, 0], sizes = [1, 512], strides = [1, 1]} : vector<8x512xf32> to vector<1x512xf32>
    %27 = vector.shape_cast %26 : vector<1x512xf32> to vector<1x512xf32>
    %28 = vector.broadcast %27 : vector<1x512xf32> to vector<8x512xf32>
    %c40 = arith.constant 40 : index
    %c0_16 = arith.constant 0 : index
    %29 = vector.load %arg5[%c40, %c0_16] : memref<64x1024xf32, #tpu.memory_space<vmem>>, vector<8x512xf32>
    tpu.vector_store %arg5[%c40, %c0_16], %28 {strides = array<i32>} : memref<64x1024xf32, #tpu.memory_space<vmem>>, vector<8x512xf32>,
    %c40_17 = arith.constant 40 : index
    %c512_18 = arith.constant 512 : index
    %30 = vector.load %arg5[%c40_17, %c512_18] : memref<64x1024xf32, #tpu.memory_space<vmem>>, vector<8x512xf32>
    tpu.vector_store %arg5[%c40_17, %c512_18], %0 {strides = array<i32>} : memref<64x1024xf32, #tpu.memory_space<vmem>>, vector<8x512xf32>,
    %31 = vector.extract_strided_slice %0 {offsets = [6, 0], sizes = [1, 512], strides = [1, 1]} : vector<8x512xf32> to vector<1x512xf32>
    %32 = vector.shape_cast %31 : vector<1x512xf32> to vector<1x512xf32>
    %33 = vector.broadcast %32 : vector<1x512xf32> to vector<8x512xf32>
    %c48 = arith.constant 48 : index
    %c0_19 = arith.constant 0 : index
    %34 = vector.load %arg5[%c48, %c0_19] : memref<64x1024xf32, #tpu.memory_space<vmem>>, vector<8x512xf32>
    tpu.vector_store %arg5[%c48, %c0_19], %33 {strides = array<i32>} : memref<64x1024xf32, #tpu.memory_space<vmem>>, vector<8x512xf32>,
    %c48_20 = arith.constant 48 : index
    %c512_21 = arith.constant 512 : index
    %35 = vector.load %arg5[%c48_20, %c512_21] : memref<64x1024xf32, #tpu.memory_space<vmem>>, vector<8x512xf32>
    tpu.vector_store %arg5[%c48_20, %c512_21], %0 {strides = array<i32>} : memref<64x1024xf32, #tpu.memory_space<vmem>>, vector<8x512xf32>,
    %36 = vector.extract_strided_slice %0 {offsets = [7, 0], sizes = [1, 512], strides = [1, 1]} : vector<8x512xf32> to vector<1x512xf32>
    %37 = vector.shape_cast %36 : vector<1x512xf32> to vector<1x512xf32>
    %38 = vector.broadcast %37 : vector<1x512xf32> to vector<8x512xf32>
    %c56 = arith.constant 56 : index
    %c0_22 = arith.constant 0 : index
    %39 = vector.load %arg5[%c56, %c0_22] : memref<64x1024xf32, #tpu.memory_space<vmem>>, vector<8x512xf32>
    tpu.vector_store %arg5[%c56, %c0_22], %38 {strides = array<i32>} : memref<64x1024xf32, #tpu.memory_space<vmem>>, vector<8x512xf32>,
    %c56_23 = arith.constant 56 : index
    %c512_24 = arith.constant 512 : index
    %40 = vector.load %arg5[%c56_23, %c512_24] : memref<64x1024xf32, #tpu.memory_space<vmem>>, vector<8x512xf32>
    tpu.vector_store %arg5[%c56_23, %c512_24], %0 {strides = array<i32>} : memref<64x1024xf32, #tpu.memory_space<vmem>>, vector<8x512xf32>,
    %c0_25 = arith.constant 0 : index
    %c0_26 = arith.constant 0 : index
    %41 = vector.load %arg1[%c0_25, %c0_26] : memref<512x1024xf32, #tpu.memory_space<vmem>>, vector<512x1024xf32>
    %cst = arith.constant dense<0.000000e+00> : vector<8x1024xf32>
    %42 = tpu.matmul %0, %41, %cst {dimension_numbers = #tpu.dot_dimension_numbers<[1], [0], [0], [1], [0, 0, 1, 1], [], []>} : vector<8x512xf32>, vector<512x1024xf32>, vector<8x1024xf32> -> vector<8x1024xf32>
    %43 = vector.extract_strided_slice %42 {offsets = [0, 0], sizes = [8, 512], strides = [1, 1]} : vector<8x1024xf32> to vector<8x512xf32>
    %c0_27 = arith.constant 0 : index
    %c0_28 = arith.constant 0 : index
    %44 = vector.load %arg2[%c0_27, %c0_28] : memref<1x512xf32, #tpu.memory_space<vmem>>, vector<1x512xf32>
    %45 = vector.broadcast %44 : vector<1x512xf32> to vector<8x512xf32>
    %46 = arith.addf %43, %45 : vector<8x512xf32>
    %47 = vector.extract_strided_slice %42 {offsets = [0, 512], sizes = [8, 512], strides = [1, 1]} : vector<8x1024xf32> to vector<8x512xf32>
    %c0_29 = arith.constant 0 : index
    %c0_30 = arith.constant 0 : index
    %48 = vector.load %arg3[%c0_29, %c0_30] : memref<1x512xf32, #tpu.memory_space<vmem>>, vector<1x512xf32>
    %c0_31 = arith.constant 0 : index
    %49 = memref.load %arg4[%c0_31] : memref<1xf32, #tpu.memory_space<smem>>
    %50 = tpu.iota {dimensions = array<i32: 0>} : vector<8x8xi32>
    %51 = tpu.iota {dimensions = array<i32: 1>} : vector<8x8xi32>
    %cst_32 = arith.constant 0.000000e+00 : f32
    %52 = vector.broadcast %cst_32 : f32 to vector<8x8xf32>
    %53 = vector.extract_strided_slice %47 {offsets = [0, 0], sizes = [1, 512], strides = [1, 1]} : vector<8x512xf32> to vector<1x512xf32>
    %54 = vector.broadcast %53 : vector<1x512xf32> to vector<8x512xf32>
    %55 = arith.addf %46, %54 : vector<8x512xf32>
    %cst_33 = arith.constant 0.000000e+00 : f32
    %56 = vector.broadcast %cst_33 : f32 to vector<8x512xf32>
    %57 = arith.maximumf %55, %56 : vector<8x512xf32>
    %58 = vector.broadcast %48 : vector<1x512xf32> to vector<8x512xf32>
    %59 = arith.mulf %57, %58 : vector<8x512xf32>
    %cst_34 = arith.constant dense<0.000000e+00> : vector<8xf32>
    %60 = vector.multi_reduction <add>, %59, %cst_34 [1] : vector<8x512xf32> to vector<8xf32>
    %61 = vector.shape_cast %60 : vector<8xf32> to vector<8x1xf32>
    %62 = vector.broadcast %49 : f32 to vector<8x1xf32>
    %63 = arith.addf %61, %62 : vector<8x1xf32>
    %c0_i32 = arith.constant 0 : i32
    %64 = vector.broadcast %c0_i32 : i32 to vector<8x8xi32>
    %65 = arith.cmpi eq, %51, %64 : vector<8x8xi32>
    %66 = vector.shape_cast %63 : vector<8x1xf32> to vector<8x1xf32>
    %67 = vector.broadcast %66 : vector<8x1xf32> to vector<8x8xf32>
    %68 = arith.select %65, %67, %52 : vector<8x8xi1>, vector<8x8xf32>
    %69 = vector.extract_strided_slice %47 {offsets = [1, 0], sizes = [1, 512], strides = [1, 1]} : vector<8x512xf32> to vector<1x512xf32>
    %70 = vector.broadcast %69 : vector<1x512xf32> to vector<8x512xf32>
    %71 = arith.addf %46, %70 : vector<8x512xf32>
    %cst_35 = arith.constant 0.000000e+00 : f32
    %72 = vector.broadcast %cst_35 : f32 to vector<8x512xf32>
    %73 = arith.maximumf %71, %72 : vector<8x512xf32>
    %74 = vector.broadcast %48 : vector<1x512xf32> to vector<8x512xf32>
    %75 = arith.mulf %73, %74 : vector<8x512xf32>
    %cst_36 = arith.constant dense<0.000000e+00> : vector<8xf32>
    %76 = vector.multi_reduction <add>, %75, %cst_36 [1] : vector<8x512xf32> to vector<8xf32>
    %77 = vector.shape_cast %76 : vector<8xf32> to vector<8x1xf32>
    %78 = vector.broadcast %49 : f32 to vector<8x1xf32>
    %79 = arith.addf %77, %78 : vector<8x1xf32>
    %c1_i32 = arith.constant 1 : i32
    %80 = vector.broadcast %c1_i32 : i32 to vector<8x8xi32>
    %81 = arith.cmpi eq, %51, %80 : vector<8x8xi32>
    %82 = vector.shape_cast %79 : vector<8x1xf32> to vector<8x1xf32>
    %83 = vector.broadcast %82 : vector<8x1xf32> to vector<8x8xf32>
    %84 = arith.select %81, %83, %68 : vector<8x8xi1>, vector<8x8xf32>
    %85 = vector.extract_strided_slice %47 {offsets = [2, 0], sizes = [1, 512], strides = [1, 1]} : vector<8x512xf32> to vector<1x512xf32>
    %86 = vector.broadcast %85 : vector<1x512xf32> to vector<8x512xf32>
    %87 = arith.addf %46, %86 : vector<8x512xf32>
    %cst_37 = arith.constant 0.000000e+00 : f32
    %88 = vector.broadcast %cst_37 : f32 to vector<8x512xf32>
    %89 = arith.maximumf %87, %88 : vector<8x512xf32>
    %90 = vector.broadcast %48 : vector<1x512xf32> to vector<8x512xf32>
    %91 = arith.mulf %89, %90 : vector<8x512xf32>
    %cst_38 = arith.constant dense<0.000000e+00> : vector<8xf32>
    %92 = vector.multi_reduction <add>, %91, %cst_38 [1] : vector<8x512xf32> to vector<8xf32>
    %93 = vector.shape_cast %92 : vector<8xf32> to vector<8x1xf32>
    %94 = vector.broadcast %49 : f32 to vector<8x1xf32>
    %95 = arith.addf %93, %94 : vector<8x1xf32>
    %c2_i32 = arith.constant 2 : i32
    %96 = vector.broadcast %c2_i32 : i32 to vector<8x8xi32>
    %97 = arith.cmpi eq, %51, %96 : vector<8x8xi32>
    %98 = vector.shape_cast %95 : vector<8x1xf32> to vector<8x1xf32>
    %99 = vector.broadcast %98 : vector<8x1xf32> to vector<8x8xf32>
    %100 = arith.select %97, %99, %84 : vector<8x8xi1>, vector<8x8xf32>
    %101 = vector.extract_strided_slice %47 {offsets = [3, 0], sizes = [1, 512], strides = [1, 1]} : vector<8x512xf32> to vector<1x512xf32>
    %102 = vector.broadcast %101 : vector<1x512xf32> to vector<8x512xf32>
    %103 = arith.addf %46, %102 : vector<8x512xf32>
    %cst_39 = arith.constant 0.000000e+00 : f32
    %104 = vector.broadcast %cst_39 : f32 to vector<8x512xf32>
    %105 = arith.maximumf %103, %104 : vector<8x512xf32>
    %106 = vector.broadcast %48 : vector<1x512xf32> to vector<8x512xf32>
    %107 = arith.mulf %105, %106 : vector<8x512xf32>
    %cst_40 = arith.constant dense<0.000000e+00> : vector<8xf32>
    %108 = vector.multi_reduction <add>, %107, %cst_40 [1] : vector<8x512xf32> to vector<8xf32>
    %109 = vector.shape_cast %108 : vector<8xf32> to vector<8x1xf32>
    %110 = vector.broadcast %49 : f32 to vector<8x1xf32>
    %111 = arith.addf %109, %110 : vector<8x1xf32>
    %c3_i32 = arith.constant 3 : i32
    %112 = vector.broadcast %c3_i32 : i32 to vector<8x8xi32>
    %113 = arith.cmpi eq, %51, %112 : vector<8x8xi32>
    %114 = vector.shape_cast %111 : vector<8x1xf32> to vector<8x1xf32>
    %115 = vector.broadcast %114 : vector<8x1xf32> to vector<8x8xf32>
    %116 = arith.select %113, %115, %100 : vector<8x8xi1>, vector<8x8xf32>
    %117 = vector.extract_strided_slice %47 {offsets = [4, 0], sizes = [1, 512], strides = [1, 1]} : vector<8x512xf32> to vector<1x512xf32>
    %118 = vector.broadcast %117 : vector<1x512xf32> to vector<8x512xf32>
    %119 = arith.addf %46, %118 : vector<8x512xf32>
    %cst_41 = arith.constant 0.000000e+00 : f32
    %120 = vector.broadcast %cst_41 : f32 to vector<8x512xf32>
    %121 = arith.maximumf %119, %120 : vector<8x512xf32>
    %122 = vector.broadcast %48 : vector<1x512xf32> to vector<8x512xf32>
    %123 = arith.mulf %121, %122 : vector<8x512xf32>
    %cst_42 = arith.constant dense<0.000000e+00> : vector<8xf32>
    %124 = vector.multi_reduction <add>, %123, %cst_42 [1] : vector<8x512xf32> to vector<8xf32>
    %125 = vector.shape_cast %124 : vector<8xf32> to vector<8x1xf32>
    %126 = vector.broadcast %49 : f32 to vector<8x1xf32>
    %127 = arith.addf %125, %126 : vector<8x1xf32>
    %c4_i32 = arith.constant 4 : i32
    %128 = vector.broadcast %c4_i32 : i32 to vector<8x8xi32>
    %129 = arith.cmpi eq, %51, %128 : vector<8x8xi32>
    %130 = vector.shape_cast %127 : vector<8x1xf32> to vector<8x1xf32>
    %131 = vector.broadcast %130 : vector<8x1xf32> to vector<8x8xf32>
    %132 = arith.select %129, %131, %116 : vector<8x8xi1>, vector<8x8xf32>
    %133 = vector.extract_strided_slice %47 {offsets = [5, 0], sizes = [1, 512], strides = [1, 1]} : vector<8x512xf32> to vector<1x512xf32>
    %134 = vector.broadcast %133 : vector<1x512xf32> to vector<8x512xf32>
    %135 = arith.addf %46, %134 : vector<8x512xf32>
    %cst_43 = arith.constant 0.000000e+00 : f32
    %136 = vector.broadcast %cst_43 : f32 to vector<8x512xf32>
    %137 = arith.maximumf %135, %136 : vector<8x512xf32>
    %138 = vector.broadcast %48 : vector<1x512xf32> to vector<8x512xf32>
    %139 = arith.mulf %137, %138 : vector<8x512xf32>
    %cst_44 = arith.constant dense<0.000000e+00> : vector<8xf32>
    %140 = vector.multi_reduction <add>, %139, %cst_44 [1] : vector<8x512xf32> to vector<8xf32>
    %141 = vector.shape_cast %140 : vector<8xf32> to vector<8x1xf32>
    %142 = vector.broadcast %49 : f32 to vector<8x1xf32>
    %143 = arith.addf %141, %142 : vector<8x1xf32>
    %c5_i32 = arith.constant 5 : i32
    %144 = vector.broadcast %c5_i32 : i32 to vector<8x8xi32>
    %145 = arith.cmpi eq, %51, %144 : vector<8x8xi32>
    %146 = vector.shape_cast %143 : vector<8x1xf32> to vector<8x1xf32>
    %147 = vector.broadcast %146 : vector<8x1xf32> to vector<8x8xf32>
    %148 = arith.select %145, %147, %132 : vector<8x8xi1>, vector<8x8xf32>
    %149 = vector.extract_strided_slice %47 {offsets = [6, 0], sizes = [1, 512], strides = [1, 1]} : vector<8x512xf32> to vector<1x512xf32>
    %150 = vector.broadcast %149 : vector<1x512xf32> to vector<8x512xf32>
    %151 = arith.addf %46, %150 : vector<8x512xf32>
    %cst_45 = arith.constant 0.000000e+00 : f32
    %152 = vector.broadcast %cst_45 : f32 to vector<8x512xf32>
    %153 = arith.maximumf %151, %152 : vector<8x512xf32>
    %154 = vector.broadcast %48 : vector<1x512xf32> to vector<8x512xf32>
    %155 = arith.mulf %153, %154 : vector<8x512xf32>
    %cst_46 = arith.constant dense<0.000000e+00> : vector<8xf32>
    %156 = vector.multi_reduction <add>, %155, %cst_46 [1] : vector<8x512xf32> to vector<8xf32>
    %157 = vector.shape_cast %156 : vector<8xf32> to vector<8x1xf32>
    %158 = vector.broadcast %49 : f32 to vector<8x1xf32>
    %159 = arith.addf %157, %158 : vector<8x1xf32>
    %c6_i32 = arith.constant 6 : i32
    %160 = vector.broadcast %c6_i32 : i32 to vector<8x8xi32>
    %161 = arith.cmpi eq, %51, %160 : vector<8x8xi32>
    %162 = vector.shape_cast %159 : vector<8x1xf32> to vector<8x1xf32>
    %163 = vector.broadcast %162 : vector<8x1xf32> to vector<8x8xf32>
    %164 = arith.select %161, %163, %148 : vector<8x8xi1>, vector<8x8xf32>
    %165 = vector.extract_strided_slice %47 {offsets = [7, 0], sizes = [1, 512], strides = [1, 1]} : vector<8x512xf32> to vector<1x512xf32>
    %166 = vector.broadcast %165 : vector<1x512xf32> to vector<8x512xf32>
    %167 = arith.addf %46, %166 : vector<8x512xf32>
    %cst_47 = arith.constant 0.000000e+00 : f32
    %168 = vector.broadcast %cst_47 : f32 to vector<8x512xf32>
    %169 = arith.maximumf %167, %168 : vector<8x512xf32>
    %170 = vector.broadcast %48 : vector<1x512xf32> to vector<8x512xf32>
    %171 = arith.mulf %169, %170 : vector<8x512xf32>
    %cst_48 = arith.constant dense<0.000000e+00> : vector<8xf32>
    %172 = vector.multi_reduction <add>, %171, %cst_48 [1] : vector<8x512xf32> to vector<8xf32>
    %173 = vector.shape_cast %172 : vector<8xf32> to vector<8x1xf32>
    %174 = vector.broadcast %49 : f32 to vector<8x1xf32>
    %175 = arith.addf %173, %174 : vector<8x1xf32>
    %c7_i32 = arith.constant 7 : i32
    %176 = vector.broadcast %c7_i32 : i32 to vector<8x8xi32>
    %177 = arith.cmpi eq, %51, %176 : vector<8x8xi32>
    %178 = vector.shape_cast %175 : vector<8x1xf32> to vector<8x1xf32>
    %179 = vector.broadcast %178 : vector<8x1xf32> to vector<8x8xf32>
    %180 = arith.select %177, %179, %164 : vector<8x8xi1>, vector<8x8xf32>
    %181 = arith.cmpi eq, %50, %51 : vector<8x8xi32>
    %cst_49 = arith.constant 1.000000e+00 : f32
    %182 = vector.broadcast %cst_49 : f32 to vector<8x8xf32>
    %183 = arith.select %181, %182, %180 : vector<8x8xi1>, vector<8x8xf32>
    %c0_50 = arith.constant 0 : index
    %c0_51 = arith.constant 0 : index
    %184 = vector.load %arg6[%c0_50, %c0_51] : memref<8x8xf32, #tpu.memory_space<vmem>>, vector<8x8xf32>
    tpu.vector_store %arg6[%c0_50, %c0_51], %183 {strides = array<i32>} : memref<8x8xf32, #tpu.memory_space<vmem>>, vector<8x8xf32>,
    return
  }
}

</mosaic_0001>

<bundles_post_ra>
// kernel: tpu_custom_call.1
= control target key start
LH: loop header
LB: loop body
LE: loop exit
PB: predicated region body
PF: predicated region fallthrough
CT: control target
= control target key end

     0   :  { %13 = vsyncpa [#allocation4], 0  ;;  %s2239_s0 = inlined_call_operand.hbm [shape: f32[8,512], index: 0, kind: input, shape index: {}]   ;;  %s2240_s1 = inlined_call_operand.hbm [shape: f32[512,1024], index: 1, kind: input, shape index: {}]   ;;  %s2241_s2 = inlined_call_operand.hbm [shape: f32[1,512], index: 2, kind: input, shape index: {}]   ;;  %s2242_s3 = inlined_call_operand.hbm [shape: f32[1,512], index: 3, kind: input, shape index: {}]   ;;  %s2243_s4 = inlined_call_operand.<no memory space> [shape: f32[1], index: 4, kind: input, shape index: {}]   ;;  %s2244_s5 = inlined_call_operand.hbm [shape: f32[64,1024], index: 5, kind: output, shape index: {0}]   ;;  %s2245_s6 = inlined_call_operand.hbm [shape: f32[8,8], index: 6, kind: output, shape index: {1}]  }
   0x1   :  { %14 = vsyncpa [#allocation7], 0 }
   0x2   :  { %15 = vsyncpa [#allocation10], 0 }
   0x3   :  { %16 = vsyncpa [#allocation5], 0 }
   0x4   :  { %17 = vsyncpa [#allocation13], 0  ;;  %s1871_s21 = smov [#allocation6]  }
   0x5   :  { %s33_s22 = sshll.u32 %s1871_s21, 4  ;;  %s34_s22 = int_to_ptr.vmem [resolvable:$true] %s33_s22 }
   0x6   :  { %s1749_s23 = scalar_lea.vmem %s34_s22, 65536  ;;  %p1754_p1 = scmp.lt.s32.totalorder %s34_s22, %s34_s22 }
   0x7   :  { %p1750_p0 = scmp.ne.s32.totalorder %s34_s22, %s1749_s23  ;;  %p1755_p2 = scmp.lt.s32.totalorder %s1749_s23, %s1749_s23 }
   0x9   :  { %p1756_p3 = por %p1755_p2, %p1754_p1 }
   0xb   :  { %p1757_p4 = pnand %p1756_p3, %p1750_p0 }
   0xd   :  { %1760 = shalt.err (!%p1757_p4)
}
   0xe   :  { %s1872_s24 = smov 1024   ;;  %s1873_s25 = smov 64  }
   0xf   :  { %39 = dma.hbm_to_vmem [thread:$0]  %s2240_s1, 65536, %s34_s22, [#allocation7], %s1872_s24, %s1872_s24, %s1873_s25  }
  0x10   :  { %s1874_s28 = smov [#allocation3]   ;;  %s1875_s30 = smov [#allocation8]  }
  0x11   :  { %s24_s29 = sshll.u32 %s1874_s28, 4  ;;  %s46_s7 = sshll.u32 %s1875_s30, 4  ;;  %s25_s29 = int_to_ptr.vmem [resolvable:$true] %s24_s29  ;;  %s47_s7 = int_to_ptr.vmem [resolvable:$true] %s46_s7 }
  0x12   :  { %s1769_s8 = scalar_lea.vmem %s25_s29, 512  ;;  %p1774_p6 = scmp.lt.s32.totalorder %s25_s29, %s25_s29 }
  0x13   :  { %p1770_p5 = scmp.ne.s32.totalorder %s25_s29, %s1769_s8  ;;  %p1775_p7 = scmp.lt.s32.totalorder %s1769_s8, %s1769_s8 }
  0x15   :  { %p1776_p8 = por %p1775_p7, %p1774_p6 }
  0x17   :  { %p1777_p9 = pnand %p1776_p8, %p1770_p5 }
  0x19   :  { %1780 = shalt.err (!%p1777_p9)
}
  0x1a   :  { %27 = dma.hbm_to_vmem [thread:$0]  %s2239_s0, 512, %s25_s29, [#allocation4]  }
  0x1b   :  { %s1789_s11 = scalar_lea.vmem %s47_s7, 64  ;;  %p1794_p11 = scmp.lt.s32.totalorder %s47_s7, %s47_s7 }
  0x1c   :  { %p1790_p10 = scmp.ne.s32.totalorder %s47_s7, %s1789_s11  ;;  %p1795_p12 = scmp.lt.s32.totalorder %s1789_s11, %s1789_s11 }
  0x1e   :  { %p1796_p13 = por %p1795_p12, %p1794_p11 }
  0x20   :  { %p1797_p0 = pnand %p1796_p13, %p1790_p10 }
  0x22   :  { %1800 = shalt.err (!%p1797_p0)
}
  0x23   :  { %49 = dma.hbm_to_vmem [thread:$0]  %s2241_s2, 64, %s47_s7, [#allocation7]  }
  0x24   :  { %s1876_s13 = smov [#allocation9]  }
  0x25   :  { %s56_s14 = sshll.u32 %s1876_s13, 4  ;;  %s57_s14 = int_to_ptr.vmem [resolvable:$true] %s56_s14 }
  0x26   :  { %s1809_s15 = scalar_lea.vmem %s57_s14, 64  ;;  %p1814_p2 = scmp.lt.s32.totalorder %s57_s14, %s57_s14 }
  0x27   :  { %p1810_p1 = scmp.ne.s32.totalorder %s57_s14, %s1809_s15  ;;  %p1815_p3 = scmp.lt.s32.totalorder %s1809_s15, %s1809_s15 }
  0x29   :  { %p1816_p4 = por %p1815_p3, %p1814_p2 }
  0x2b   :  { %p1817_p5 = pnand %p1816_p4, %p1810_p1 }
  0x2d   :  { %1820 = shalt.err (!%p1817_p5)
}
  0x2e   :  { %59 = dma.hbm_to_vmem [thread:$0]  %s2242_s3, 64, %s57_s14, [#allocation10]  }
  0x2f   :  { %1861 = dma.done.wait [#allocation4], 512  }
  0x30   :  { %1862 = vsyncadd [#allocation4], 4294966784 }
  0x31   :  { %1863 = dma.done.wait [#allocation7], 65600  }
  0x32   :  { %1864 = vsyncadd [#allocation7], 4294901696 }
  0x33   :  { %1865 = dma.done.wait [#allocation10], 64  }
  0x34   :  { %1866 = vsyncadd [#allocation10], 4294967232  ;;  %v391_v0 = vld [vmem:[#allocation6 + $0x3c8] sm:$0xff]  ;;  %v390_v2 = vld [vmem:[#allocation6 + $0x3c0] sm:$0xff]  ;;  %s1877_s2 = smov [#allocation11]  }
  0x35   :  { %v647_v1 = vld [vmem:[#allocation6 + $0xbc8] sm:$0xff]  ;;  %782 = vmatprep.subr.mxu0 %v391_v0  ;;  %v646_v3 = vld [vmem:[#allocation6 + $0xbc0] sm:$0xff]  ;;  %s1701_s3 = sshll.u32 %s1877_s2, 4  ;;  %s1702_s3 = int_to_ptr.vmem [resolvable:$true] %s1701_s3 }
  0x36   :  { %853 = vmatprep.subr.mxu1 %v647_v1  ;;  %v383_v4 = vld [vmem:[#allocation6 + $0x388] sm:$0xff]  ;;  %783 = vmatpush1.msra.mxu0 %v390_v2  ;;  %v382_v6 = vld [vmem:[#allocation6 + $0x380] sm:$0xff]  ;;  %s1821_s17 = scalar_lea.vmem %s1702_s3, 8192  ;;  %p1826_p7 = scmp.lt.s32.totalorder %s1702_s3, %s1702_s3 }
  0x37   :  { %v639_v5 = vld [vmem:[#allocation6 + $0xb88] sm:$0xff]  ;;  %854 = vmatpush1.msra.mxu1 %v646_v3  ;;  %v638_v7 = vld [vmem:[#allocation6 + $0xb80] sm:$0xff]  ;;  %784 = vmatprep.subr.mxu0 %v383_v4  ;;  %p1822_p6 = scmp.ne.s32.totalorder %s1702_s3, %s1821_s17  ;;  %p1827_p8 = scmp.lt.s32.totalorder %s1821_s17, %s1821_s17 }
  0x38   :  { %v375_v8 = vld [vmem:[#allocation6 + $0x348] sm:$0xff]  ;;  %855 = vmatprep.subr.mxu1 %v639_v5  ;;  %v374_v10 = vld [vmem:[#allocation6 + $0x340] sm:$0xff]  ;;  %785 = vmatpush1.msra.mxu0 %v382_v6 }
  0x39   :  { %v631_v9 = vld [vmem:[#allocation6 + $0xb48] sm:$0xff]  ;;  %v630_v11 = vld [vmem:[#allocation6 + $0xb40] sm:$0xff]  ;;  %856 = vmatpush1.msra.mxu1 %v638_v7  ;;  %786 = vmatprep.subr.mxu0 %v375_v8  ;;  %p1828_p9 = por %p1827_p8, %p1826_p7 }
  0x3a   :  { %v367_v12 = vld [vmem:[#allocation6 + $0x308] sm:$0xff]  ;;  %857 = vmatprep.subr.mxu1 %v631_v9  ;;  %v366_v14 = vld [vmem:[#allocation6 + $0x300] sm:$0xff]  ;;  %787 = vmatpush1.msra.mxu0 %v374_v10 }
  0x3b   :  { %v623_v13 = vld [vmem:[#allocation6 + $0xb08] sm:$0xff]  ;;  %v622_v15 = vld [vmem:[#allocation6 + $0xb00] sm:$0xff]  ;;  %858 = vmatpush1.msra.mxu1 %v630_v11  ;;  %788 = vmatprep.subr.mxu0 %v367_v12  ;;  %p1829_p10 = pnand %p1828_p9, %p1822_p6 }
  0x3c   :  { %v359_v16 = vld [vmem:[#allocation6 + $0x2c8] sm:$0xff]  ;;  %859 = vmatprep.subr.mxu1 %v623_v13  ;;  %v358_v18 = vld [vmem:[#allocation6 + $0x2c0] sm:$0xff]  ;;  %789 = vmatpush1.msra.mxu0 %v366_v14 }
  0x3d   :  { %v615_v17 = vld [vmem:[#allocation6 + $0xac8] sm:$0xff]  ;;  %v614_v19 = vld [vmem:[#allocation6 + $0xac0] sm:$0xff]  ;;  %860 = vmatpush1.msra.mxu1 %v622_v15  ;;  %790 = vmatprep.subr.mxu0 %v359_v16 }
  0x3e   :  { %v351_v20 = vld [vmem:[#allocation6 + $0x288] sm:$0xff]  ;;  %861 = vmatprep.subr.mxu1 %v615_v17  ;;  %v350_v22 = vld [vmem:[#allocation6 + $0x280] sm:$0xff]  ;;  %791 = vmatpush1.msra.mxu0 %v358_v18 }
  0x3f   :  { %v607_v21 = vld [vmem:[#allocation6 + $0xa88] sm:$0xff]  ;;  %v606_v23 = vld [vmem:[#allocation6 + $0xa80] sm:$0xff]  ;;  %862 = vmatpush1.msra.mxu1 %v614_v19  ;;  %792 = vmatprep.subr.mxu0 %v351_v20 }
  0x40   :  { %v343_v24 = vld [vmem:[#allocation6 + $0x248] sm:$0xff]  ;;  %863 = vmatprep.subr.mxu1 %v607_v21  ;;  %v342_v26 = vld [vmem:[#allocation6 + $0x240] sm:$0xff]  ;;  %793 = vmatpush1.msra.mxu0 %v350_v22 }
  0x41   :  { %v599_v25 = vld [vmem:[#allocation6 + $0xa48] sm:$0xff]  ;;  %v598_v27 = vld [vmem:[#allocation6 + $0xa40] sm:$0xff]  ;;  %864 = vmatpush1.msra.mxu1 %v606_v23  ;;  %794 = vmatprep.subr.mxu0 %v343_v24 }
  0x42   :  { %v335_v28 = vld [vmem:[#allocation6 + $0x208] sm:$0xff]  ;;  %865 = vmatprep.subr.mxu1 %v599_v25  ;;  %v334_v30 = vld [vmem:[#allocation6 + $0x200] sm:$0xff]  ;;  %795 = vmatpush1.msra.mxu0 %v342_v26 }
  0x43   :  { %v591_v29 = vld [vmem:[#allocation6 + $0xa08] sm:$0xff]  ;;  %v590_v31 = vld [vmem:[#allocation6 + $0xa00] sm:$0xff]  ;;  %866 = vmatpush1.msra.mxu1 %v598_v27  ;;  %796 = vmatprep.subr.mxu0 %v335_v28 }
  0x44   :  { %v327_v32 = vld [vmem:[#allocation6 + $0x1c8] sm:$0xff]  ;;  %867 = vmatprep.subr.mxu1 %v591_v29  ;;  %v326_v34 = vld [vmem:[#allocation6 + $0x1c0] sm:$0xff]  ;;  %797 = vmatpush1.msra.mxu0 %v334_v30  ;;  %v1939_v29 = vld [vmem:[#allocation3 + $0x18] sm:$0xff] }
  0x45   :  { %v583_v33 = vld [vmem:[#allocation6 + $0x9c8] sm:$0xff]  ;;  %v582_v35 = vld [vmem:[#allocation6 + $0x9c0] sm:$0xff]  ;;  %868 = vmatpush1.msra.mxu1 %v590_v31  ;;  %798 = vmatprep.subr.mxu0 %v327_v32  ;;  %v1943_v31 = vld [vmem:[#allocation3 + $0x10] sm:$0xff]  ;;  %101 = vst [vmem:[#allocation11 + $0x38] sm:$0xff] %v1939_v29 }
  0x46   :  { %v319_v36 = vld [vmem:[#allocation6 + $0x188] sm:$0xff]  ;;  %869 = vmatprep.subr.mxu1 %v583_v33  ;;  %v318_v38 = vld [vmem:[#allocation6 + $0x180] sm:$0xff]  ;;  %799 = vmatpush1.msra.mxu0 %v326_v34  ;;  %125 = vst [vmem:[#allocation11 + $0x78] sm:$0xff] %v1939_v29  ;;  %149 = vst [vmem:[#allocation11 + $0xb8] sm:$0xff] %v1939_v29 }
  0x47   :  { %v575_v37 = vld [vmem:[#allocation6 + $0x988] sm:$0xff]  ;;  %v574_v39 = vld [vmem:[#allocation6 + $0x980] sm:$0xff]  ;;  %870 = vmatpush1.msra.mxu1 %v582_v35  ;;  %800 = vmatprep.subr.mxu0 %v319_v36  ;;  %173 = vst [vmem:[#allocation11 + $0xf8] sm:$0xff] %v1939_v29  ;;  %197 = vst [vmem:[#allocation11 + $0x138] sm:$0xff] %v1939_v29 }
  0x48   :  { %v311_v40 = vld [vmem:[#allocation6 + $0x148] sm:$0xff]  ;;  %871 = vmatprep.subr.mxu1 %v575_v37  ;;  %v310_v42 = vld [vmem:[#allocation6 + $0x140] sm:$0xff]  ;;  %801 = vmatpush1.msra.mxu0 %v318_v38  ;;  %221 = vst [vmem:[#allocation11 + $0x178] sm:$0xff] %v1939_v29  ;;  %245 = vst [vmem:[#allocation11 + $0x1b8] sm:$0xff] %v1939_v29 }
  0x49   :  { %v567_v41 = vld [vmem:[#allocation6 + $0x948] sm:$0xff]  ;;  %v566_v43 = vld [vmem:[#allocation6 + $0x940] sm:$0xff]  ;;  %872 = vmatpush1.msra.mxu1 %v574_v39  ;;  %802 = vmatprep.subr.mxu0 %v311_v40  ;;  %269 = vst [vmem:[#allocation11 + $0x1f8] sm:$0xff] %v1939_v29  ;;  %100 = vst [vmem:[#allocation11 + $0x30] sm:$0xff] %v1943_v31 }
  0x4a   :  { %v303_v44 = vld [vmem:[#allocation6 + $0x108] sm:$0xff]  ;;  %873 = vmatprep.subr.mxu1 %v567_v41  ;;  %v302_v46 = vld [vmem:[#allocation6 + $0x100] sm:$0xff]  ;;  %803 = vmatpush1.msra.mxu0 %v310_v42  ;;  %124 = vst [vmem:[#allocation11 + $0x70] sm:$0xff] %v1943_v31  ;;  %148 = vst [vmem:[#allocation11 + $0xb0] sm:$0xff] %v1943_v31 }
  0x4b   :  { %v559_v45 = vld [vmem:[#allocation6 + $0x908] sm:$0xff]  ;;  %v558_v47 = vld [vmem:[#allocation6 + $0x900] sm:$0xff]  ;;  %874 = vmatpush1.msra.mxu1 %v566_v43  ;;  %804 = vmatprep.subr.mxu0 %v303_v44  ;;  %172 = vst [vmem:[#allocation11 + $0xf0] sm:$0xff] %v1943_v31  ;;  %196 = vst [vmem:[#allocation11 + $0x130] sm:$0xff] %v1943_v31 }
  0x4c   :  { %v295_v48 = vld [vmem:[#allocation6 + $0xc8] sm:$0xff]  ;;  %875 = vmatprep.subr.mxu1 %v559_v45  ;;  %v294_v50 = vld [vmem:[#allocation6 + $0xc0] sm:$0xff]  ;;  %805 = vmatpush1.msra.mxu0 %v302_v46  ;;  %220 = vst [vmem:[#allocation11 + $0x170] sm:$0xff] %v1943_v31  ;;  %244 = vst [vmem:[#allocation11 + $0x1b0] sm:$0xff] %v1943_v31 }
  0x4d   :  { %v551_v49 = vld [vmem:[#allocation6 + $0x8c8] sm:$0xff]  ;;  %v550_v51 = vld [vmem:[#allocation6 + $0x8c0] sm:$0xff]  ;;  %876 = vmatpush1.msra.mxu1 %v558_v47  ;;  %806 = vmatprep.subr.mxu0 %v295_v48  ;;  %268 = vst [vmem:[#allocation11 + $0x1f0] sm:$0xff] %v1943_v31 }
  0x4e   :  { %v287_v52 = vld [vmem:[#allocation6 + $0x88] sm:$0xff]  ;;  %877 = vmatprep.subr.mxu1 %v551_v49  ;;  %v286_v54 = vld [vmem:[#allocation6 + $0x80] sm:$0xff]  ;;  %807 = vmatpush1.msra.mxu0 %v294_v50 }
  0x4f   :  { %v543_v53 = vld [vmem:[#allocation6 + $0x888] sm:$0xff]  ;;  %v542_v55 = vld [vmem:[#allocation6 + $0x880] sm:$0xff]  ;;  %878 = vmatpush1.msra.mxu1 %v550_v51  ;;  %808 = vmatprep.subr.mxu0 %v287_v52 }
  0x50   :  { %v279_v56 = vld [vmem:[#allocation6 + $0x48] sm:$0xff]  ;;  %879 = vmatprep.subr.mxu1 %v543_v53  ;;  %v278_v58 = vld [vmem:[#allocation6 + $0x40] sm:$0xff]  ;;  %809 = vmatpush1.msra.mxu0 %v286_v54 }
  0x51   :  { %v535_v57 = vld [vmem:[#allocation6 + $0x848] sm:$0xff]  ;;  %v534_v59 = vld [vmem:[#allocation6 + $0x840] sm:$0xff]  ;;  %880 = vmatpush1.msra.mxu1 %v542_v55  ;;  %810 = vmatprep.subr.mxu0 %v279_v56 }
  0x52   :  { %v271_v60 = vld [vmem:[#allocation6 + $0x8] sm:$0xff]  ;;  %881 = vmatprep.subr.mxu1 %v535_v57  ;;  %v270_v62 = vld [vmem:[#allocation6] sm:$0xff]  ;;  %811 = vmatpush1.msra.mxu0 %v278_v58 }
  0x53   :  { %v527_v61 = vld [vmem:[#allocation6 + $0x808] sm:$0xff]  ;;  %v526_v63 = vld [vmem:[#allocation6 + $0x800] sm:$0xff]  ;;  %882 = vmatpush1.msra.mxu1 %v534_v59  ;;  %812 = vmatprep.subr.mxu0 %v271_v60 }
  0x54   :  { %v519_v0 = vld [vmem:[#allocation6 + $0x7c8] sm:$0xff]  ;;  %883 = vmatprep.subr.mxu1 %v527_v61  ;;  %v518_v2 = vld [vmem:[#allocation6 + $0x7c0] sm:$0xff]  ;;  %813 = vmatpush1.msra.mxu0 %v270_v62 }
  0x55   :  { %v775_v1 = vld [vmem:[#allocation6 + $0xfc8] sm:$0xff]  ;;  %v774_v3 = vld [vmem:[#allocation6 + $0xfc0] sm:$0xff]  ;;  %884 = vmatpush1.msra.mxu1 %v526_v63  ;;  %814 = vmatprep.subr.mxu0 %v519_v0 }
  0x56   :  { %v511_v4 = vld [vmem:[#allocation6 + $0x788] sm:$0xff]  ;;  %885 = vmatprep.subr.mxu1 %v775_v1  ;;  %v510_v6 = vld [vmem:[#allocation6 + $0x780] sm:$0xff]  ;;  %815 = vmatpush2.msra.mxu0 %v518_v2 }
  0x57   :  { %v767_v5 = vld [vmem:[#allocation6 + $0xf88] sm:$0xff]  ;;  %v766_v7 = vld [vmem:[#allocation6 + $0xf80] sm:$0xff]  ;;  %886 = vmatpush2.msra.mxu1 %v774_v3  ;;  %816 = vmatprep.subr.mxu0 %v511_v4  ;;  %v393_v4 = vld [vmem:[#allocation6 + $0x3d8] sm:$0xff] }
  0x58   :  { %v503_v8 = vld [vmem:[#allocation6 + $0x748] sm:$0xff]  ;;  %887 = vmatprep.subr.mxu1 %v767_v5  ;;  %v502_v10 = vld [vmem:[#allocation6 + $0x740] sm:$0xff]  ;;  %817 = vmatpush2.msra.mxu0 %v510_v6  ;;  %v649_v5 = vld [vmem:[#allocation6 + $0xbd8] sm:$0xff] }
  0x59   :  { %v759_v9 = vld [vmem:[#allocation6 + $0xf48] sm:$0xff]  ;;  %v758_v11 = vld [vmem:[#allocation6 + $0xf40] sm:$0xff]  ;;  %888 = vmatpush2.msra.mxu1 %v766_v7  ;;  %818 = vmatprep.subr.mxu0 %v503_v8  ;;  %v392_v6 = vld [vmem:[#allocation6 + $0x3d0] sm:$0xff] }
  0x5a   :  { %v495_v12 = vld [vmem:[#allocation6 + $0x708] sm:$0xff]  ;;  %889 = vmatprep.subr.mxu1 %v759_v9  ;;  %v494_v14 = vld [vmem:[#allocation6 + $0x700] sm:$0xff]  ;;  %819 = vmatpush2.msra.mxu0 %v502_v10  ;;  %v648_v7 = vld [vmem:[#allocation6 + $0xbd0] sm:$0xff] }
  0x5b   :  { %v751_v13 = vld [vmem:[#allocation6 + $0xf08] sm:$0xff]  ;;  %v750_v15 = vld [vmem:[#allocation6 + $0xf00] sm:$0xff]  ;;  %890 = vmatpush2.msra.mxu1 %v758_v11  ;;  %820 = vmatprep.subr.mxu0 %v495_v12  ;;  %v385_v8 = vld [vmem:[#allocation6 + $0x398] sm:$0xff] }
  0x5c   :  { %v487_v16 = vld [vmem:[#allocation6 + $0x6c8] sm:$0xff]  ;;  %891 = vmatprep.subr.mxu1 %v751_v13  ;;  %v486_v18 = vld [vmem:[#allocation6 + $0x6c0] sm:$0xff]  ;;  %821 = vmatpush2.msra.mxu0 %v494_v14  ;;  %v641_v9 = vld [vmem:[#allocation6 + $0xb98] sm:$0xff] }
  0x5d   :  { %v743_v17 = vld [vmem:[#allocation6 + $0xec8] sm:$0xff]  ;;  %v742_v19 = vld [vmem:[#allocation6 + $0xec0] sm:$0xff]  ;;  %892 = vmatpush2.msra.mxu1 %v750_v15  ;;  %822 = vmatprep.subr.mxu0 %v487_v16  ;;  %v384_v10 = vld [vmem:[#allocation6 + $0x390] sm:$0xff] }
  0x5e   :  { %v479_v20 = vld [vmem:[#allocation6 + $0x688] sm:$0xff]  ;;  %v478_v22 = vld [vmem:[#allocation6 + $0x680] sm:$0xff]  ;;  %893 = vmatprep.subr.mxu1 %v743_v17  ;;  %823 = vmatpush2.msra.mxu0 %v486_v18  ;;  %v640_v11 = vld [vmem:[#allocation6 + $0xb90] sm:$0xff] }
  0x5f   :  { %v735_v21 = vld [vmem:[#allocation6 + $0xe88] sm:$0xff]  ;;  %v734_v23 = vld [vmem:[#allocation6 + $0xe80] sm:$0xff]  ;;  %894 = vmatpush2.msra.mxu1 %v742_v19  ;;  %824 = vmatprep.subr.mxu0 %v479_v20  ;;  %v377_v12 = vld [vmem:[#allocation6 + $0x358] sm:$0xff] }
  0x60   :  { %v471_v24 = vld [vmem:[#allocation6 + $0x648] sm:$0xff]  ;;  %v470_v26 = vld [vmem:[#allocation6 + $0x640] sm:$0xff]  ;;  %895 = vmatprep.subr.mxu1 %v735_v21  ;;  %825 = vmatpush2.msra.mxu0 %v478_v22  ;;  %v633_v13 = vld [vmem:[#allocation6 + $0xb58] sm:$0xff] }
  0x61   :  { %v727_v25 = vld [vmem:[#allocation6 + $0xe48] sm:$0xff]  ;;  %v726_v27 = vld [vmem:[#allocation6 + $0xe40] sm:$0xff]  ;;  %896 = vmatpush2.msra.mxu1 %v734_v23  ;;  %826 = vmatprep.subr.mxu0 %v471_v24  ;;  %v376_v14 = vld [vmem:[#allocation6 + $0x350] sm:$0xff] }
  0x62   :  { %v1929_v28 = vld [vmem:[#allocation3 + $0x8] sm:$0xff]  ;;  %v1941_v30 = vld [vmem:[#allocation3] sm:$0xff]  ;;  %897 = vmatprep.subr.mxu1 %v727_v25  ;;  %827 = vmatpush2.msra.mxu0 %v470_v26  ;;  %v632_v15 = vld [vmem:[#allocation6 + $0xb50] sm:$0xff] }
  0x63   :  { %99 = vst [vmem:[#allocation11 + $0x28] sm:$0xff] %v1929_v28  ;;  %123 = vst [vmem:[#allocation11 + $0x68] sm:$0xff] %v1929_v28  ;;  %v463_v32 = vld [vmem:[#allocation6 + $0x608] sm:$0xff]  ;;  %v462_v34 = vld [vmem:[#allocation6 + $0x600] sm:$0xff]  ;;  %898 = vmatpush2.msra.mxu1 %v726_v27  ;;  %846 = vmatprep.mubr.f32.mxu0 %v1929_v28 }
  0x64   :  { %147 = vst [vmem:[#allocation11 + $0xa8] sm:$0xff] %v1929_v28  ;;  %171 = vst [vmem:[#allocation11 + $0xe8] sm:$0xff] %v1929_v28  ;;  %v719_v33 = vld [vmem:[#allocation6 + $0xe08] sm:$0xff]  ;;  %v718_v35 = vld [vmem:[#allocation6 + $0xe00] sm:$0xff]  ;;  %828 = vmatprep.subr.mxu0 %v463_v32  ;;  %917 = vmatprep.mubr.f32.mxu1 %v1939_v29 }
  0x65   :  { %195 = vst [vmem:[#allocation11 + $0x128] sm:$0xff] %v1929_v28  ;;  %219 = vst [vmem:[#allocation11 + $0x168] sm:$0xff] %v1929_v28  ;;  %v455_v36 = vld [vmem:[#allocation6 + $0x5c8] sm:$0xff]  ;;  %899 = vmatprep.subr.mxu1 %v719_v33  ;;  %v454_v38 = vld [vmem:[#allocation6 + $0x5c0] sm:$0xff]  ;;  %829 = vmatpush2.msra.mxu0 %v462_v34 }
  0x66   :  { %243 = vst [vmem:[#allocation11 + $0x1a8] sm:$0xff] %v1929_v28  ;;  %267 = vst [vmem:[#allocation11 + $0x1e8] sm:$0xff] %v1929_v28  ;;  %v711_v37 = vld [vmem:[#allocation6 + $0xdc8] sm:$0xff]  ;;  %v710_v39 = vld [vmem:[#allocation6 + $0xdc0] sm:$0xff]  ;;  %900 = vmatpush2.msra.mxu1 %v718_v35  ;;  %830 = vmatprep.subr.mxu0 %v455_v36 }
  0x67   :  { %98 = vst [vmem:[#allocation11 + $0x20] sm:$0xff] %v1941_v30  ;;  %122 = vst [vmem:[#allocation11 + $0x60] sm:$0xff] %v1941_v30  ;;  %v447_v40 = vld [vmem:[#allocation6 + $0x588] sm:$0xff]  ;;  %901 = vmatprep.subr.mxu1 %v711_v37  ;;  %v446_v42 = vld [vmem:[#allocation6 + $0x580] sm:$0xff]  ;;  %831 = vmatpush2.msra.mxu0 %v454_v38 }
  0x68   :  { %146 = vst [vmem:[#allocation11 + $0xa0] sm:$0xff] %v1941_v30  ;;  %170 = vst [vmem:[#allocation11 + $0xe0] sm:$0xff] %v1941_v30  ;;  %v703_v41 = vld [vmem:[#allocation6 + $0xd88] sm:$0xff]  ;;  %v702_v43 = vld [vmem:[#allocation6 + $0xd80] sm:$0xff]  ;;  %902 = vmatpush2.msra.mxu1 %v710_v39  ;;  %832 = vmatprep.subr.mxu0 %v447_v40 }
  0x69   :  { %194 = vst [vmem:[#allocation11 + $0x120] sm:$0xff] %v1941_v30  ;;  %218 = vst [vmem:[#allocation11 + $0x160] sm:$0xff] %v1941_v30  ;;  %v439_v44 = vld [vmem:[#allocation6 + $0x548] sm:$0xff]  ;;  %903 = vmatprep.subr.mxu1 %v703_v41  ;;  %v438_v46 = vld [vmem:[#allocation6 + $0x540] sm:$0xff]  ;;  %833 = vmatpush2.msra.mxu0 %v446_v42 }
  0x6a   :  { %242 = vst [vmem:[#allocation11 + $0x1a0] sm:$0xff] %v1941_v30  ;;  %266 = vst [vmem:[#allocation11 + $0x1e0] sm:$0xff] %v1941_v30  ;;  %v695_v45 = vld [vmem:[#allocation6 + $0xd48] sm:$0xff]  ;;  %v694_v47 = vld [vmem:[#allocation6 + $0xd40] sm:$0xff]  ;;  %904 = vmatpush2.msra.mxu1 %v702_v43  ;;  %834 = vmatprep.subr.mxu0 %v439_v44 }
  0x6b   :  { %v431_v48 = vld [vmem:[#allocation6 + $0x508] sm:$0xff]  ;;  %905 = vmatprep.subr.mxu1 %v695_v45  ;;  %v430_v50 = vld [vmem:[#allocation6 + $0x500] sm:$0xff]  ;;  %835 = vmatpush2.msra.mxu0 %v438_v46  ;;  %v369_v16 = vld [vmem:[#allocation6 + $0x318] sm:$0xff] }
  0x6c   :  { %v687_v49 = vld [vmem:[#allocation6 + $0xd08] sm:$0xff]  ;;  %v686_v51 = vld [vmem:[#allocation6 + $0xd00] sm:$0xff]  ;;  %906 = vmatpush2.msra.mxu1 %v694_v47  ;;  %836 = vmatprep.subr.mxu0 %v431_v48  ;;  %v625_v17 = vld [vmem:[#allocation6 + $0xb18] sm:$0xff] }
  0x6d   :  { %v423_v52 = vld [vmem:[#allocation6 + $0x4c8] sm:$0xff]  ;;  %907 = vmatprep.subr.mxu1 %v687_v49  ;;  %v422_v54 = vld [vmem:[#allocation6 + $0x4c0] sm:$0xff]  ;;  %837 = vmatpush2.msra.mxu0 %v430_v50  ;;  %v368_v18 = vld [vmem:[#allocation6 + $0x310] sm:$0xff] }
  0x6e   :  { %v679_v53 = vld [vmem:[#allocation6 + $0xcc8] sm:$0xff]  ;;  %v678_v55 = vld [vmem:[#allocation6 + $0xcc0] sm:$0xff]  ;;  %908 = vmatpush2.msra.mxu1 %v686_v51  ;;  %838 = vmatprep.subr.mxu0 %v423_v52  ;;  %v624_v19 = vld [vmem:[#allocation6 + $0xb10] sm:$0xff] }
  0x6f   :  { %v415_v56 = vld [vmem:[#allocation6 + $0x488] sm:$0xff]  ;;  %909 = vmatprep.subr.mxu1 %v679_v53  ;;  %v414_v58 = vld [vmem:[#allocation6 + $0x480] sm:$0xff]  ;;  %839 = vmatpush2.msra.mxu0 %v422_v54  ;;  %v361_v20 = vld [vmem:[#allocation6 + $0x2d8] sm:$0xff] }
  0x70   :  { %v671_v57 = vld [vmem:[#allocation6 + $0xc88] sm:$0xff]  ;;  %v670_v59 = vld [vmem:[#allocation6 + $0xc80] sm:$0xff]  ;;  %910 = vmatpush2.msra.mxu1 %v678_v55  ;;  %840 = vmatprep.subr.mxu0 %v415_v56  ;;  %v617_v21 = vld [vmem:[#allocation6 + $0xad8] sm:$0xff] }
  0x71   :  { %v407_v60 = vld [vmem:[#allocation6 + $0x448] sm:$0xff]  ;;  %911 = vmatprep.subr.mxu1 %v671_v57  ;;  %v406_v62 = vld [vmem:[#allocation6 + $0x440] sm:$0xff]  ;;  %841 = vmatpush2.msra.mxu0 %v414_v58  ;;  %v360_v22 = vld [vmem:[#allocation6 + $0x2d0] sm:$0xff] }
  0x72   :  { %v663_v61 = vld [vmem:[#allocation6 + $0xc48] sm:$0xff]  ;;  %v662_v63 = vld [vmem:[#allocation6 + $0xc40] sm:$0xff]  ;;  %912 = vmatpush2.msra.mxu1 %v670_v59  ;;  %842 = vmatprep.subr.mxu0 %v407_v60  ;;  %v616_v23 = vld [vmem:[#allocation6 + $0xad0] sm:$0xff] }
  0x73   :  { %v399_v0 = vld [vmem:[#allocation6 + $0x408] sm:$0xff]  ;;  %913 = vmatprep.subr.mxu1 %v663_v61  ;;  %v398_v2 = vld [vmem:[#allocation6 + $0x400] sm:$0xff]  ;;  %843 = vmatpush2.msra.mxu0 %v406_v62  ;;  %v353_v24 = vld [vmem:[#allocation6 + $0x298] sm:$0xff] }
  0x74   :  { %v655_v1 = vld [vmem:[#allocation6 + $0xc08] sm:$0xff]  ;;  %914 = vmatpush2.msra.mxu1 %v662_v63  ;;  %v654_v3 = vld [vmem:[#allocation6 + $0xc00] sm:$0xff]  ;;  %844 = vmatprep.subr.mxu0 %v399_v0  ;;  %v609_v25 = vld [vmem:[#allocation6 + $0xa98] sm:$0xff] }
  0x75   :  { %915 = vmatprep.subr.mxu1 %v655_v1  ;;  %845 = vmatpush2.msra.mxu0 %v398_v2  ;;  %v352_v26 = vld [vmem:[#allocation6 + $0x290] sm:$0xff]  ;;  %v345_v32 = vld [vmem:[#allocation6 + $0x258] sm:$0xff] }
  0x76   :  { %916 = vmatpush2.msra.mxu1 %v654_v3  ;;  %847 = vmatmul.mubr.f32.vlgmr.msra.gmra.mxu0 %v1941_v30  ;;  %v608_v27 = vld [vmem:[#allocation6 + $0xa90] sm:$0xff]  ;;  %v601_v33 = vld [vmem:[#allocation6 + $0xa58] sm:$0xff] }
  0x77   :  { %918 = vmatmul.mubr.f32.vlgmr.msra.gmra.mxu1 %v1943_v31  ;;  %924 = vmatprep.subr.mxu0 %v393_v4  ;;  %v344_v34 = vld [vmem:[#allocation6 + $0x250] sm:$0xff]  ;;  %v337_v36 = vld [vmem:[#allocation6 + $0x218] sm:$0xff] }
  0x78   :  { %995 = vmatprep.subr.mxu1 %v649_v5  ;;  %925 = vmatpush1.msra.mxu0 %v392_v6  ;;  %v600_v35 = vld [vmem:[#allocation6 + $0xa50] sm:$0xff]  ;;  %v593_v37 = vld [vmem:[#allocation6 + $0xa18] sm:$0xff] }
  0x79   :  { %996 = vmatpush1.msra.mxu1 %v648_v7  ;;  %926 = vmatprep.subr.mxu0 %v385_v8  ;;  %v336_v38 = vld [vmem:[#allocation6 + $0x210] sm:$0xff]  ;;  %v329_v40 = vld [vmem:[#allocation6 + $0x1d8] sm:$0xff] }
  0x7a   :  { %997 = vmatprep.subr.mxu1 %v641_v9  ;;  %927 = vmatpush1.msra.mxu0 %v384_v10  ;;  %v592_v39 = vld [vmem:[#allocation6 + $0xa10] sm:$0xff]  ;;  %v585_v41 = vld [vmem:[#allocation6 + $0x9d8] sm:$0xff] }
  0x7b   :  { %998 = vmatpush1.msra.mxu1 %v640_v11  ;;  %928 = vmatprep.subr.mxu0 %v377_v12  ;;  %v328_v42 = vld [vmem:[#allocation6 + $0x1d0] sm:$0xff]  ;;  %v321_v44 = vld [vmem:[#allocation6 + $0x198] sm:$0xff] }
  0x7c   :  { %999 = vmatprep.subr.mxu1 %v633_v13  ;;  %929 = vmatpush1.msra.mxu0 %v376_v14  ;;  %v584_v43 = vld [vmem:[#allocation6 + $0x9d0] sm:$0xff]  ;;  %v577_v45 = vld [vmem:[#allocation6 + $0x998] sm:$0xff] }
  0x7d   :  { %1000 = vmatpush1.msra.mxu1 %v632_v15  ;;  %930 = vmatprep.subr.mxu0 %v369_v16  ;;  %v320_v46 = vld [vmem:[#allocation6 + $0x190] sm:$0xff]  ;;  %v313_v48 = vld [vmem:[#allocation6 + $0x158] sm:$0xff] }
  0x7e   :  { %1001 = vmatprep.subr.mxu1 %v625_v17  ;;  %931 = vmatpush1.msra.mxu0 %v368_v18  ;;  %v576_v47 = vld [vmem:[#allocation6 + $0x990] sm:$0xff]  ;;  %v569_v49 = vld [vmem:[#allocation6 + $0x958] sm:$0xff] }
  0x7f   :  { %1002 = vmatpush1.msra.mxu1 %v624_v19  ;;  %932 = vmatprep.subr.mxu0 %v361_v20  ;;  %v312_v50 = vld [vmem:[#allocation6 + $0x150] sm:$0xff]  ;;  %v305_v52 = vld [vmem:[#allocation6 + $0x118] sm:$0xff] }
  0x80   :  { %1003 = vmatprep.subr.mxu1 %v617_v21  ;;  %933 = vmatpush1.msra.mxu0 %v360_v22  ;;  %v568_v51 = vld [vmem:[#allocation6 + $0x950] sm:$0xff]  ;;  %v561_v53 = vld [vmem:[#allocation6 + $0x918] sm:$0xff] }
  0x81   :  { %1004 = vmatpush1.msra.mxu1 %v616_v23  ;;  %934 = vmatprep.subr.mxu0 %v353_v24  ;;  %v304_v54 = vld [vmem:[#allocation6 + $0x110] sm:$0xff]  ;;  %v297_v56 = vld [vmem:[#allocation6 + $0xd8] sm:$0xff] }
  0x82   :  { %1005 = vmatprep.subr.mxu1 %v609_v25  ;;  %935 = vmatpush1.msra.mxu0 %v352_v26  ;;  %v560_v55 = vld [vmem:[#allocation6 + $0x910] sm:$0xff]  ;;  %v553_v57 = vld [vmem:[#allocation6 + $0x8d8] sm:$0xff] }
  0x83   :  { %1006 = vmatpush1.msra.mxu1 %v608_v27  ;;  %936 = vmatprep.subr.mxu0 %v345_v32  ;;  %v296_v58 = vld [vmem:[#allocation6 + $0xd0] sm:$0xff]  ;;  %v289_v60 = vld [vmem:[#allocation6 + $0x98] sm:$0xff] }
  0x84   :  { %1007 = vmatprep.subr.mxu1 %v601_v33  ;;  %937 = vmatpush1.msra.mxu0 %v344_v34  ;;  %v552_v59 = vld [vmem:[#allocation6 + $0x8d0] sm:$0xff]  ;;  %v545_v61 = vld [vmem:[#allocation6 + $0x898] sm:$0xff] }
  0x85   :  { %1008 = vmatpush1.msra.mxu1 %v600_v35  ;;  %938 = vmatprep.subr.mxu0 %v337_v36  ;;  %v288_v62 = vld [vmem:[#allocation6 + $0x90] sm:$0xff]  ;;  %v281_v0 = vld [vmem:[#allocation6 + $0x58] sm:$0xff] }
  0x86   :  { %1009 = vmatprep.subr.mxu1 %v593_v37  ;;  %939 = vmatpush1.msra.mxu0 %v336_v38  ;;  %v544_v63 = vld [vmem:[#allocation6 + $0x890] sm:$0xff]  ;;  %v537_v1 = vld [vmem:[#allocation6 + $0x858] sm:$0xff] }
  0x87   :  { %1010 = vmatpush1.msra.mxu1 %v592_v39  ;;  %940 = vmatprep.subr.mxu0 %v329_v40  ;;  %v280_v2 = vld [vmem:[#allocation6 + $0x50] sm:$0xff]  ;;  %v273_v4 = vld [vmem:[#allocation6 + $0x18] sm:$0xff] }
  0x88   :  { %1011 = vmatprep.subr.mxu1 %v585_v41  ;;  %941 = vmatpush1.msra.mxu0 %v328_v42  ;;  %v536_v3 = vld [vmem:[#allocation6 + $0x850] sm:$0xff]  ;;  %v529_v5 = vld [vmem:[#allocation6 + $0x818] sm:$0xff] }
  0x89   :  { %1012 = vmatpush1.msra.mxu1 %v584_v43  ;;  %942 = vmatprep.subr.mxu0 %v321_v44  ;;  %v272_v6 = vld [vmem:[#allocation6 + $0x10] sm:$0xff]  ;;  %v521_v8 = vld [vmem:[#allocation6 + $0x7d8] sm:$0xff] }
  0x8a   :  { %1013 = vmatprep.subr.mxu1 %v577_v45  ;;  %943 = vmatpush1.msra.mxu0 %v320_v46  ;;  %v528_v7 = vld [vmem:[#allocation6 + $0x810] sm:$0xff]  ;;  %v777_v9 = vld [vmem:[#allocation6 + $0xfd8] sm:$0xff] }
  0x8b   :  { %1014 = vmatpush1.msra.mxu1 %v576_v47  ;;  %944 = vmatprep.subr.mxu0 %v313_v48  ;;  %v520_v10 = vld [vmem:[#allocation6 + $0x7d0] sm:$0xff]  ;;  %v513_v12 = vld [vmem:[#allocation6 + $0x798] sm:$0xff] }
  0x8c   :  { %1015 = vmatprep.subr.mxu1 %v569_v49  ;;  %945 = vmatpush1.msra.mxu0 %v312_v50  ;;  %v776_v11 = vld [vmem:[#allocation6 + $0xfd0] sm:$0xff]  ;;  %v769_v13 = vld [vmem:[#allocation6 + $0xf98] sm:$0xff] }
  0x8d   :  { %1016 = vmatpush1.msra.mxu1 %v568_v51  ;;  %946 = vmatprep.subr.mxu0 %v305_v52  ;;  %v512_v14 = vld [vmem:[#allocation6 + $0x790] sm:$0xff]  ;;  %v505_v16 = vld [vmem:[#allocation6 + $0x758] sm:$0xff] }
  0x8e   :  { %1017 = vmatprep.subr.mxu1 %v561_v53  ;;  %947 = vmatpush1.msra.mxu0 %v304_v54  ;;  %v768_v15 = vld [vmem:[#allocation6 + $0xf90] sm:$0xff]  ;;  %v761_v17 = vld [vmem:[#allocation6 + $0xf58] sm:$0xff] }
  0x8f   :  { %1018 = vmatpush1.msra.mxu1 %v560_v55  ;;  %948 = vmatprep.subr.mxu0 %v297_v56  ;;  %v504_v18 = vld [vmem:[#allocation6 + $0x750] sm:$0xff]  ;;  %v497_v20 = vld [vmem:[#allocation6 + $0x718] sm:$0xff] }
  0x90   :  { %1019 = vmatprep.subr.mxu1 %v553_v57  ;;  %949 = vmatpush1.msra.mxu0 %v296_v58  ;;  %v760_v19 = vld [vmem:[#allocation6 + $0xf50] sm:$0xff]  ;;  %v753_v21 = vld [vmem:[#allocation6 + $0xf18] sm:$0xff] }
  0x91   :  { %1020 = vmatpush1.msra.mxu1 %v552_v59  ;;  %950 = vmatprep.subr.mxu0 %v289_v60  ;;  %v496_v22 = vld [vmem:[#allocation6 + $0x710] sm:$0xff]  ;;  %v489_v24 = vld [vmem:[#allocation6 + $0x6d8] sm:$0xff] }
  0x92   :  { %1021 = vmatprep.subr.mxu1 %v545_v61  ;;  %951 = vmatpush1.msra.mxu0 %v288_v62  ;;  %v752_v23 = vld [vmem:[#allocation6 + $0xf10] sm:$0xff]  ;;  %v745_v25 = vld [vmem:[#allocation6 + $0xed8] sm:$0xff] }
  0x93   :  { %1022 = vmatpush1.msra.mxu1 %v544_v63  ;;  %952 = vmatprep.subr.mxu0 %v281_v0  ;;  %v488_v26 = vld [vmem:[#allocation6 + $0x6d0] sm:$0xff]  ;;  %v481_v32 = vld [vmem:[#allocation6 + $0x698] sm:$0xff] }
  0x94   :  { %1023 = vmatprep.subr.mxu1 %v537_v1  ;;  %953 = vmatpush1.msra.mxu0 %v280_v2  ;;  %v744_v27 = vld [vmem:[#allocation6 + $0xed0] sm:$0xff]  ;;  %v737_v33 = vld [vmem:[#allocation6 + $0xe98] sm:$0xff] }
  0x95   :  { %1024 = vmatpush1.msra.mxu1 %v536_v3  ;;  %954 = vmatprep.subr.mxu0 %v273_v4  ;;  %v480_v34 = vld [vmem:[#allocation6 + $0x690] sm:$0xff]  ;;  %v473_v36 = vld [vmem:[#allocation6 + $0x658] sm:$0xff] }
  0x96   :  { %1025 = vmatprep.subr.mxu1 %v529_v5  ;;  %955 = vmatpush1.msra.mxu0 %v272_v6  ;;  %v736_v35 = vld [vmem:[#allocation6 + $0xe90] sm:$0xff]  ;;  %v729_v37 = vld [vmem:[#allocation6 + $0xe58] sm:$0xff] }
  0x97   :  { %1026 = vmatpush1.msra.mxu1 %v528_v7  ;;  %956 = vmatprep.subr.mxu0 %v521_v8  ;;  %v472_v38 = vld [vmem:[#allocation6 + $0x650] sm:$0xff]  ;;  %v465_v40 = vld [vmem:[#allocation6 + $0x618] sm:$0xff] }
  0x98   :  { %1027 = vmatprep.subr.mxu1 %v777_v9  ;;  %957 = vmatpush2.msra.mxu0 %v520_v10  ;;  %v728_v39 = vld [vmem:[#allocation6 + $0xe50] sm:$0xff]  ;;  %v721_v41 = vld [vmem:[#allocation6 + $0xe18] sm:$0xff] }
  0x99   :  { %1028 = vmatpush2.msra.mxu1 %v776_v11  ;;  %958 = vmatprep.subr.mxu0 %v513_v12  ;;  %v464_v42 = vld [vmem:[#allocation6 + $0x610] sm:$0xff]  ;;  %v457_v44 = vld [vmem:[#allocation6 + $0x5d8] sm:$0xff]  ;;  %v395_v12 = vld [vmem:[#allocation6 + $0x3e8] sm:$0xff] }
  0x9a   :  { %1029 = vmatprep.subr.mxu1 %v769_v13  ;;  %959 = vmatpush2.msra.mxu0 %v512_v14  ;;  %v720_v43 = vld [vmem:[#allocation6 + $0xe10] sm:$0xff]  ;;  %v713_v45 = vld [vmem:[#allocation6 + $0xdd8] sm:$0xff]  ;;  %v651_v13 = vld [vmem:[#allocation6 + $0xbe8] sm:$0xff] }
  0x9b   :  { %1030 = vmatpush2.msra.mxu1 %v768_v15  ;;  %960 = vmatprep.subr.mxu0 %v505_v16  ;;  %v456_v46 = vld [vmem:[#allocation6 + $0x5d0] sm:$0xff]  ;;  %v449_v48 = vld [vmem:[#allocation6 + $0x598] sm:$0xff]  ;;  %v394_v14 = vld [vmem:[#allocation6 + $0x3e0] sm:$0xff] }
  0x9c   :  { %1031 = vmatprep.subr.mxu1 %v761_v17  ;;  %961 = vmatpush2.msra.mxu0 %v504_v18  ;;  %v712_v47 = vld [vmem:[#allocation6 + $0xdd0] sm:$0xff]  ;;  %v705_v49 = vld [vmem:[#allocation6 + $0xd98] sm:$0xff]  ;;  %v650_v15 = vld [vmem:[#allocation6 + $0xbe0] sm:$0xff]  ;;  %v78_v18 = vlaneseq }
  0x9d   :  { %1032 = vmatpush2.msra.mxu1 %v760_v19  ;;  %962 = vmatprep.subr.mxu0 %v497_v20  ;;  %v448_v50 = vld [vmem:[#allocation6 + $0x590] sm:$0xff]  ;;  %v441_v52 = vld [vmem:[#allocation6 + $0x558] sm:$0xff]  ;;  %v387_v16 = vld [vmem:[#allocation6 + $0x3a8] sm:$0xff] }
  0x9e   :  { %1033 = vmatprep.subr.mxu1 %v753_v21  ;;  %963 = vmatpush2.msra.mxu0 %v496_v22  ;;  %v704_v51 = vld [vmem:[#allocation6 + $0xd90] sm:$0xff]  ;;  %v697_v53 = vld [vmem:[#allocation6 + $0xd58] sm:$0xff]  ;;  %v643_v17 = vld [vmem:[#allocation6 + $0xba8] sm:$0xff] }
  0x9f   :  { %1034 = vmatpush2.msra.mxu1 %v752_v23  ;;  %964 = vmatprep.subr.mxu0 %v489_v24  ;;  %v440_v54 = vld [vmem:[#allocation6 + $0x550] sm:$0xff]  ;;  %v433_v56 = vld [vmem:[#allocation6 + $0x518] sm:$0xff]  ;;  %v386_v19 = vld [vmem:[#allocation6 + $0x3a0] sm:$0xff]  ;;  %v1978_v23 = vshrl.u32 %v78_v18, 7 }
  0xa0   :  { %1035 = vmatprep.subr.mxu1 %v745_v25  ;;  %965 = vmatpush2.msra.mxu0 %v488_v26  ;;  %v696_v55 = vld [vmem:[#allocation6 + $0xd50] sm:$0xff]  ;;  %v689_v57 = vld [vmem:[#allocation6 + $0xd18] sm:$0xff]  ;;  %v642_v20 = vld [vmem:[#allocation6 + $0xba0] sm:$0xff] }
  0xa1   :  { %1036 = vmatpush2.msra.mxu1 %v744_v27  ;;  %966 = vmatprep.subr.mxu0 %v481_v32  ;;  %v432_v58 = vld [vmem:[#allocation6 + $0x510] sm:$0xff]  ;;  %v425_v60 = vld [vmem:[#allocation6 + $0x4d8] sm:$0xff]  ;;  %v379_v21 = vld [vmem:[#allocation6 + $0x368] sm:$0xff]  ;;  %v1981_v32 = vsub.s32 0, %v1978_v23 }
  0xa2   :  { %1037 = vmatprep.subr.mxu1 %v737_v33  ;;  %967 = vmatpush2.msra.mxu0 %v480_v34  ;;  %v688_v59 = vld [vmem:[#allocation6 + $0xd10] sm:$0xff]  ;;  %v681_v61 = vld [vmem:[#allocation6 + $0xcd8] sm:$0xff]  ;;  %v635_v22 = vld [vmem:[#allocation6 + $0xb68] sm:$0xff] }
  0xa3   :  { %1038 = vmatpush2.msra.mxu1 %v736_v35  ;;  %968 = vmatprep.subr.mxu0 %v473_v36  ;;  %v424_v62 = vld [vmem:[#allocation6 + $0x4d0] sm:$0xff]  ;;  %v417_v0 = vld [vmem:[#allocation6 + $0x498] sm:$0xff]  ;;  %v378_v24 = vld [vmem:[#allocation6 + $0x360] sm:$0xff]  ;;  %v1984_v35 = vsub.s32 1, %v1978_v23 }
  0xa4   :  { %1039 = vmatprep.subr.mxu1 %v729_v37  ;;  %969 = vmatpush2.msra.mxu0 %v472_v38  ;;  %v680_v63 = vld [vmem:[#allocation6 + $0xcd0] sm:$0xff]  ;;  %v673_v1 = vld [vmem:[#allocation6 + $0xc98] sm:$0xff]  ;;  %v634_v25 = vld [vmem:[#allocation6 + $0xb60] sm:$0xff]  ;;  %v81_v38 = vrot.slane %v1941_v30, %v1981_v32 }
  0xa5   :  { %1040 = vmatpush2.msra.mxu1 %v728_v39  ;;  %970 = vmatprep.subr.mxu0 %v465_v40  ;;  %v416_v2 = vld [vmem:[#allocation6 + $0x490] sm:$0xff]  ;;  %v409_v4 = vld [vmem:[#allocation6 + $0x458] sm:$0xff]  ;;  %v371_v26 = vld [vmem:[#allocation6 + $0x328] sm:$0xff]  ;;  %v85_v39 = vrot.slane %v1929_v28, %v1981_v32  ;;  %v89_v40 = vrot.slane %v1943_v31, %v1981_v32 }
  0xa6   :  { %1041 = vmatprep.subr.mxu1 %v721_v41  ;;  %971 = vmatpush2.msra.mxu0 %v464_v42  ;;  %v672_v3 = vld [vmem:[#allocation6 + $0xc90] sm:$0xff]  ;;  %v665_v5 = vld [vmem:[#allocation6 + $0xc58] sm:$0xff]  ;;  %v627_v27 = vld [vmem:[#allocation6 + $0xb28] sm:$0xff]  ;;  %94 = vst [vmem:[#allocation11] sm:$0xff] %v81_v38 }
  0xa7   :  { %1042 = vmatpush2.msra.mxu1 %v720_v43  ;;  %972 = vmatprep.subr.mxu0 %v457_v44  ;;  %v408_v6 = vld [vmem:[#allocation6 + $0x450] sm:$0xff]  ;;  %v401_v8 = vld [vmem:[#allocation6 + $0x418] sm:$0xff]  ;;  %v370_v33 = vld [vmem:[#allocation6 + $0x320] sm:$0xff]  ;;  %v93_v43 = vrot.slane %v1939_v29, %v1981_v32  ;;  %v105_v44 = vrot.slane %v1941_v30, %v1984_v35  ;;  %95 = vst [vmem:[#allocation11 + $0x8] sm:$0xff] %v85_v39 }
  0xa8   :  { %1043 = vmatprep.subr.mxu1 %v713_v45  ;;  %973 = vmatpush2.msra.mxu0 %v456_v46  ;;  %v664_v7 = vld [vmem:[#allocation6 + $0xc50] sm:$0xff]  ;;  %v657_v9 = vld [vmem:[#allocation6 + $0xc18] sm:$0xff]  ;;  %v626_v34 = vld [vmem:[#allocation6 + $0xb20] sm:$0xff]  ;;  %v109_v45 = vrot.slane %v1929_v28, %v1984_v35  ;;  %96 = vst [vmem:[#allocation11 + $0x10] sm:$0xff] %v89_v40 }
  0xa9   :  { %1044 = vmatpush2.msra.mxu1 %v712_v47  ;;  %974 = vmatprep.subr.mxu0 %v449_v48  ;;  %v400_v10 = vld [vmem:[#allocation6 + $0x410] sm:$0xff]  ;;  %v363_v36 = vld [vmem:[#allocation6 + $0x2e8] sm:$0xff]  ;;  %v362_v41 = vld [vmem:[#allocation6 + $0x2e0] sm:$0xff]  ;;  %v113_v48 = vrot.slane %v1943_v31, %v1984_v35  ;;  %97 = vst [vmem:[#allocation11 + $0x18] sm:$0xff] %v93_v43 }
  0xaa   :  { %1045 = vmatprep.subr.mxu1 %v705_v49  ;;  %975 = vmatpush2.msra.mxu0 %v448_v50  ;;  %v656_v11 = vld [vmem:[#allocation6 + $0xc10] sm:$0xff]  ;;  %v619_v37 = vld [vmem:[#allocation6 + $0xae8] sm:$0xff]  ;;  %v618_v42 = vld [vmem:[#allocation6 + $0xae0] sm:$0xff]  ;;  %v117_v49 = vrot.slane %v1939_v29, %v1984_v35  ;;  %118 = vst [vmem:[#allocation11 + $0x40] sm:$0xff] %v105_v44 }
  0xab   :  { %1046 = vmatpush2.msra.mxu1 %v704_v51  ;;  %976 = vmatprep.subr.mxu0 %v441_v52  ;;  %v355_v46 = vld [vmem:[#allocation6 + $0x2a8] sm:$0xff]  ;;  %v354_v50 = vld [vmem:[#allocation6 + $0x2a0] sm:$0xff]  ;;  %119 = vst [vmem:[#allocation11 + $0x48] sm:$0xff] %v109_v45  ;;  %120 = vst [vmem:[#allocation11 + $0x50] sm:$0xff] %v113_v48 }
  0xac   :  { %1047 = vmatprep.subr.mxu1 %v697_v53  ;;  %977 = vmatpush2.msra.mxu0 %v440_v54  ;;  %v611_v47 = vld [vmem:[#allocation6 + $0xaa8] sm:$0xff]  ;;  %121 = vst [vmem:[#allocation11 + $0x58] sm:$0xff] %v117_v49  ;;  %v346_v52 = vld [vmem:[#allocation6 + $0x260] sm:$0xff] }
  0xad   :  { %1048 = vmatpush2.msra.mxu1 %v696_v55  ;;  %978 = vmatprep.subr.mxu0 %v433_v56  ;;  %v603_v51 = vld [vmem:[#allocation6 + $0xa68] sm:$0xff]  ;;  %v338_v54 = vld [vmem:[#allocation6 + $0x220] sm:$0xff] }
  0xae   :  { %1049 = vmatprep.subr.mxu1 %v689_v57  ;;  %979 = vmatpush2.msra.mxu0 %v432_v58  ;;  %v595_v53 = vld [vmem:[#allocation6 + $0xa28] sm:$0xff]  ;;  %v594_v55 = vld [vmem:[#allocation6 + $0xa20] sm:$0xff] }
  0xaf   :  { %1050 = vmatpush2.msra.mxu1 %v688_v59  ;;  %980 = vmatprep.subr.mxu0 %v425_v60  ;;  %v331_v56 = vld [vmem:[#allocation6 + $0x1e8] sm:$0xff]  ;;  %v330_v58 = vld [vmem:[#allocation6 + $0x1e0] sm:$0xff] }
  0xb0   :  { %1051 = vmatprep.subr.mxu1 %v681_v61  ;;  %981 = vmatpush2.msra.mxu0 %v424_v62  ;;  %v587_v57 = vld [vmem:[#allocation6 + $0x9e8] sm:$0xff]  ;;  %v586_v59 = vld [vmem:[#allocation6 + $0x9e0] sm:$0xff] }
  0xb1   :  { %1052 = vmatpush2.msra.mxu1 %v680_v63  ;;  %982 = vmatprep.subr.mxu0 %v417_v0  ;;  %v323_v60 = vld [vmem:[#allocation6 + $0x1a8] sm:$0xff]  ;;  %v322_v62 = vld [vmem:[#allocation6 + $0x1a0] sm:$0xff] }
  0xb2   :  { %1053 = vmatprep.subr.mxu1 %v673_v1  ;;  %983 = vmatpush2.msra.mxu0 %v416_v2  ;;  %v579_v61 = vld [vmem:[#allocation6 + $0x9a8] sm:$0xff]  ;;  %v578_v63 = vld [vmem:[#allocation6 + $0x9a0] sm:$0xff] }
  0xb3   :  { %1054 = vmatpush2.msra.mxu1 %v672_v3  ;;  %984 = vmatprep.subr.mxu0 %v409_v4  ;;  %v315_v0 = vld [vmem:[#allocation6 + $0x168] sm:$0xff]  ;;  %v314_v2 = vld [vmem:[#allocation6 + $0x160] sm:$0xff] }
  0xb4   :  { %1055 = vmatprep.subr.mxu1 %v665_v5  ;;  %985 = vmatpush2.msra.mxu0 %v408_v6  ;;  %v571_v1 = vld [vmem:[#allocation6 + $0x968] sm:$0xff]  ;;  %v570_v3 = vld [vmem:[#allocation6 + $0x960] sm:$0xff] }
  0xb5   :  { %1056 = vmatpush2.msra.mxu1 %v664_v7  ;;  %986 = vmatprep.subr.mxu0 %v401_v8  ;;  %v307_v4 = vld [vmem:[#allocation6 + $0x128] sm:$0xff]  ;;  %v306_v6 = vld [vmem:[#allocation6 + $0x120] sm:$0xff] }
  0xb6   :  { %1057 = vmatprep.subr.mxu1 %v657_v9  ;;  %987 = vmatpush2.msra.mxu0 %v400_v10  ;;  %v563_v5 = vld [vmem:[#allocation6 + $0x928] sm:$0xff]  ;;  %v562_v7 = vld [vmem:[#allocation6 + $0x920] sm:$0xff] }
  0xb7   :  { %988 = vmatprep.mubr.f32.mxu0 %v1929_v28  ;;  %1058 = vmatpush2.msra.mxu1 %v656_v11  ;;  %v347_v28 = vld [vmem:[#allocation6 + $0x268] sm:$0xff]  ;;  %v298_v10 = vld [vmem:[#allocation6 + $0xe0] sm:$0xff] }
  0xb8   :  { %1059 = vmatprep.mubr.f32.mxu1 %v1939_v29  ;;  %989 = vmatmul.mubr.f32.vlgmr.msra.gmra.mxu0 %v1941_v30  ;;  %v610_v30 = vld [vmem:[#allocation6 + $0xaa0] sm:$0xff]  ;;  %v339_v29 = vld [vmem:[#allocation6 + $0x228] sm:$0xff] }
  0xb9   :  { %1060 = vmatmul.mubr.f32.vlgmr.msra.gmra.mxu1 %v1943_v31  ;;  %1066 = vmatprep.subr.mxu0 %v395_v12  ;;  %v602_v31 = vld [vmem:[#allocation6 + $0xa60] sm:$0xff]  ;;  %v299_v8 = vld [vmem:[#allocation6 + $0xe8] sm:$0xff] }
  0xba   :  { %1137 = vmatprep.subr.mxu1 %v651_v13  ;;  %1067 = vmatpush1.msra.mxu0 %v394_v14  ;;  %v555_v9 = vld [vmem:[#allocation6 + $0x8e8] sm:$0xff]  ;;  %v554_v11 = vld [vmem:[#allocation6 + $0x8e0] sm:$0xff] }
  0xbb   :  { %1138 = vmatpush1.msra.mxu1 %v650_v15  ;;  %1068 = vmatprep.subr.mxu0 %v387_v16  ;;  %v291_v12 = vld [vmem:[#allocation6 + $0xa8] sm:$0xff]  ;;  %v290_v14 = vld [vmem:[#allocation6 + $0xa0] sm:$0xff] }
  0xbc   :  { %1139 = vmatprep.subr.mxu1 %v643_v17  ;;  %1069 = vmatpush1.msra.mxu0 %v386_v19  ;;  %v547_v13 = vld [vmem:[#allocation6 + $0x8a8] sm:$0xff]  ;;  %v546_v15 = vld [vmem:[#allocation6 + $0x8a0] sm:$0xff] }
  0xbd   :  { %1140 = vmatpush1.msra.mxu1 %v642_v20  ;;  %1070 = vmatprep.subr.mxu0 %v379_v21  ;;  %v283_v16 = vld [vmem:[#allocation6 + $0x68] sm:$0xff]  ;;  %v282_v19 = vld [vmem:[#allocation6 + $0x60] sm:$0xff] }
  0xbe   :  { %1141 = vmatprep.subr.mxu1 %v635_v22  ;;  %1071 = vmatpush1.msra.mxu0 %v378_v24  ;;  %v539_v17 = vld [vmem:[#allocation6 + $0x868] sm:$0xff]  ;;  %v538_v20 = vld [vmem:[#allocation6 + $0x860] sm:$0xff] }
  0xbf   :  { %1142 = vmatpush1.msra.mxu1 %v634_v25  ;;  %1072 = vmatprep.subr.mxu0 %v371_v26  ;;  %v275_v21 = vld [vmem:[#allocation6 + $0x28] sm:$0xff]  ;;  %v274_v24 = vld [vmem:[#allocation6 + $0x20] sm:$0xff] }
  0xc0   :  { %1143 = vmatprep.subr.mxu1 %v627_v27  ;;  %1073 = vmatpush1.msra.mxu0 %v370_v33  ;;  %v531_v22 = vld [vmem:[#allocation6 + $0x828] sm:$0xff]  ;;  %v530_v25 = vld [vmem:[#allocation6 + $0x820] sm:$0xff] }
  0xc1   :  { %1144 = vmatpush1.msra.mxu1 %v626_v34  ;;  %1074 = vmatprep.subr.mxu0 %v363_v36  ;;  %v523_v26 = vld [vmem:[#allocation6 + $0x7e8] sm:$0xff]  ;;  %v522_v33 = vld [vmem:[#allocation6 + $0x7e0] sm:$0xff] }
  0xc2   :  { %1145 = vmatprep.subr.mxu1 %v619_v37  ;;  %1075 = vmatpush1.msra.mxu0 %v362_v41  ;;  %v779_v27 = vld [vmem:[#allocation6 + $0xfe8] sm:$0xff]  ;;  %v778_v34 = vld [vmem:[#allocation6 + $0xfe0] sm:$0xff] }
  0xc3   :  { %1146 = vmatpush1.msra.mxu1 %v618_v42  ;;  %1076 = vmatprep.subr.mxu0 %v355_v46  ;;  %v515_v36 = vld [vmem:[#allocation6 + $0x7a8] sm:$0xff]  ;;  %v514_v38 = vld [vmem:[#allocation6 + $0x7a0] sm:$0xff] }
  0xc4   :  { %1147 = vmatprep.subr.mxu1 %v611_v47  ;;  %1077 = vmatpush1.msra.mxu0 %v354_v50  ;;  %v771_v37 = vld [vmem:[#allocation6 + $0xfa8] sm:$0xff]  ;;  %v770_v39 = vld [vmem:[#allocation6 + $0xfa0] sm:$0xff] }
  0xc5   :  { %1148 = vmatpush1.msra.mxu1 %v610_v30  ;;  %1078 = vmatprep.subr.mxu0 %v347_v28  ;;  %v507_v40 = vld [vmem:[#allocation6 + $0x768] sm:$0xff]  ;;  %v506_v42 = vld [vmem:[#allocation6 + $0x760] sm:$0xff] }
  0xc6   :  { %1149 = vmatprep.subr.mxu1 %v603_v51  ;;  %1079 = vmatpush1.msra.mxu0 %v346_v52  ;;  %v763_v41 = vld [vmem:[#allocation6 + $0xf68] sm:$0xff]  ;;  %v762_v43 = vld [vmem:[#allocation6 + $0xf60] sm:$0xff] }
  0xc7   :  { %1150 = vmatpush1.msra.mxu1 %v602_v31  ;;  %1080 = vmatprep.subr.mxu0 %v339_v29  ;;  %v499_v44 = vld [vmem:[#allocation6 + $0x728] sm:$0xff]  ;;  %v498_v46 = vld [vmem:[#allocation6 + $0x720] sm:$0xff] }
  0xc8   :  { %1151 = vmatprep.subr.mxu1 %v595_v53  ;;  %1081 = vmatpush1.msra.mxu0 %v338_v54  ;;  %v755_v45 = vld [vmem:[#allocation6 + $0xf28] sm:$0xff]  ;;  %v754_v47 = vld [vmem:[#allocation6 + $0xf20] sm:$0xff] }
  0xc9   :  { %1152 = vmatpush1.msra.mxu1 %v594_v55  ;;  %1082 = vmatprep.subr.mxu0 %v331_v56  ;;  %v491_v48 = vld [vmem:[#allocation6 + $0x6e8] sm:$0xff]  ;;  %v490_v50 = vld [vmem:[#allocation6 + $0x6e0] sm:$0xff] }
  0xca   :  { %1153 = vmatprep.subr.mxu1 %v587_v57  ;;  %1083 = vmatpush1.msra.mxu0 %v330_v58  ;;  %v747_v49 = vld [vmem:[#allocation6 + $0xee8] sm:$0xff]  ;;  %v746_v30 = vld [vmem:[#allocation6 + $0xee0] sm:$0xff] }
  0xcb   :  { %1154 = vmatpush1.msra.mxu1 %v586_v59  ;;  %1084 = vmatprep.subr.mxu0 %v323_v60  ;;  %v483_v28 = vld [vmem:[#allocation6 + $0x6a8] sm:$0xff]  ;;  %v482_v52 = vld [vmem:[#allocation6 + $0x6a0] sm:$0xff] }
  0xcc   :  { %1155 = vmatprep.subr.mxu1 %v579_v61  ;;  %1085 = vmatpush1.msra.mxu0 %v322_v62  ;;  %v739_v51 = vld [vmem:[#allocation6 + $0xea8] sm:$0xff]  ;;  %v738_v31 = vld [vmem:[#allocation6 + $0xea0] sm:$0xff] }
  0xcd   :  { %1156 = vmatpush1.msra.mxu1 %v578_v63  ;;  %1086 = vmatprep.subr.mxu0 %v315_v0  ;;  %v475_v29 = vld [vmem:[#allocation6 + $0x668] sm:$0xff]  ;;  %v474_v54 = vld [vmem:[#allocation6 + $0x660] sm:$0xff] }
  0xce   :  { %1157 = vmatprep.subr.mxu1 %v571_v1  ;;  %1087 = vmatpush1.msra.mxu0 %v314_v2  ;;  %v731_v53 = vld [vmem:[#allocation6 + $0xe68] sm:$0xff]  ;;  %v730_v55 = vld [vmem:[#allocation6 + $0xe60] sm:$0xff] }
  0xcf   :  { %1158 = vmatpush1.msra.mxu1 %v570_v3  ;;  %1088 = vmatprep.subr.mxu0 %v307_v4  ;;  %v467_v56 = vld [vmem:[#allocation6 + $0x628] sm:$0xff]  ;;  %v466_v58 = vld [vmem:[#allocation6 + $0x620] sm:$0xff] }
  0xd0   :  { %1159 = vmatprep.subr.mxu1 %v563_v5  ;;  %1089 = vmatpush1.msra.mxu0 %v306_v6  ;;  %v723_v57 = vld [vmem:[#allocation6 + $0xe28] sm:$0xff]  ;;  %v722_v59 = vld [vmem:[#allocation6 + $0xe20] sm:$0xff] }
  0xd1   :  { %1160 = vmatpush1.msra.mxu1 %v562_v7  ;;  %1090 = vmatprep.subr.mxu0 %v299_v8  ;;  %v459_v60 = vld [vmem:[#allocation6 + $0x5e8] sm:$0xff]  ;;  %v458_v62 = vld [vmem:[#allocation6 + $0x5e0] sm:$0xff] }
  0xd2   :  { %1161 = vmatprep.subr.mxu1 %v555_v9  ;;  %1091 = vmatpush1.msra.mxu0 %v298_v10  ;;  %v715_v61 = vld [vmem:[#allocation6 + $0xde8] sm:$0xff]  ;;  %v714_v63 = vld [vmem:[#allocation6 + $0xde0] sm:$0xff] }
  0xd3   :  { %1162 = vmatpush1.msra.mxu1 %v554_v11  ;;  %1092 = vmatprep.subr.mxu0 %v291_v12  ;;  %v451_v0 = vld [vmem:[#allocation6 + $0x5a8] sm:$0xff]  ;;  %v450_v2 = vld [vmem:[#allocation6 + $0x5a0] sm:$0xff] }
  0xd4   :  { %1163 = vmatprep.subr.mxu1 %v547_v13  ;;  %1093 = vmatpush1.msra.mxu0 %v290_v14  ;;  %v707_v1 = vld [vmem:[#allocation6 + $0xda8] sm:$0xff]  ;;  %v706_v3 = vld [vmem:[#allocation6 + $0xda0] sm:$0xff] }
  0xd5   :  { %1164 = vmatpush1.msra.mxu1 %v546_v15  ;;  %1094 = vmatprep.subr.mxu0 %v283_v16  ;;  %v443_v4 = vld [vmem:[#allocation6 + $0x568] sm:$0xff]  ;;  %v442_v6 = vld [vmem:[#allocation6 + $0x560] sm:$0xff] }
  0xd6   :  { %1165 = vmatprep.subr.mxu1 %v539_v17  ;;  %1095 = vmatpush1.msra.mxu0 %v282_v19  ;;  %v699_v5 = vld [vmem:[#allocation6 + $0xd68] sm:$0xff]  ;;  %v698_v7 = vld [vmem:[#allocation6 + $0xd60] sm:$0xff] }
  0xd7   :  { %1166 = vmatpush1.msra.mxu1 %v538_v20  ;;  %1096 = vmatprep.subr.mxu0 %v275_v21  ;;  %v435_v8 = vld [vmem:[#allocation6 + $0x528] sm:$0xff]  ;;  %v434_v10 = vld [vmem:[#allocation6 + $0x520] sm:$0xff] }
  0xd8   :  { %1167 = vmatprep.subr.mxu1 %v531_v22  ;;  %1097 = vmatpush1.msra.mxu0 %v274_v24  ;;  %v691_v9 = vld [vmem:[#allocation6 + $0xd28] sm:$0xff]  ;;  %v690_v11 = vld [vmem:[#allocation6 + $0xd20] sm:$0xff] }
  0xd9   :  { %1168 = vmatpush1.msra.mxu1 %v530_v25  ;;  %1098 = vmatprep.subr.mxu0 %v523_v26  ;;  %v427_v12 = vld [vmem:[#allocation6 + $0x4e8] sm:$0xff]  ;;  %v426_v14 = vld [vmem:[#allocation6 + $0x4e0] sm:$0xff] }
  0xda   :  { %1169 = vmatprep.subr.mxu1 %v779_v27  ;;  %1099 = vmatpush2.msra.mxu0 %v522_v33  ;;  %v683_v13 = vld [vmem:[#allocation6 + $0xce8] sm:$0xff]  ;;  %v682_v15 = vld [vmem:[#allocation6 + $0xce0] sm:$0xff] }
  0xdb   :  { %1170 = vmatpush2.msra.mxu1 %v778_v34  ;;  %1100 = vmatprep.subr.mxu0 %v515_v36  ;;  %v419_v16 = vld [vmem:[#allocation6 + $0x4a8] sm:$0xff]  ;;  %v418_v19 = vld [vmem:[#allocation6 + $0x4a0] sm:$0xff]  ;;  %v2002_v36 = vld [vmem:[#allocation11 + $0x28] sm:$0xff] }
  0xdc   :  { %1171 = vmatprep.subr.mxu1 %v771_v37  ;;  %1101 = vmatpush2.msra.mxu0 %v514_v38  ;;  %v675_v17 = vld [vmem:[#allocation6 + $0xca8] sm:$0xff]  ;;  %v674_v20 = vld [vmem:[#allocation6 + $0xca0] sm:$0xff]  ;;  %v397_v37 = vld [vmem:[#allocation6 + $0x3f8] sm:$0xff] }
  0xdd   :  { %1172 = vmatpush2.msra.mxu1 %v770_v39  ;;  %1102 = vmatprep.subr.mxu0 %v507_v40  ;;  %v411_v21 = vld [vmem:[#allocation6 + $0x468] sm:$0xff]  ;;  %v410_v24 = vld [vmem:[#allocation6 + $0x460] sm:$0xff]  ;;  %v653_v38 = vld [vmem:[#allocation6 + $0xbf8] sm:$0xff]  ;;  %v2006_v39 = vsub.s32 2, %v1978_v23 }
  0xde   :  { %1173 = vmatprep.subr.mxu1 %v763_v41  ;;  %1103 = vmatpush2.msra.mxu0 %v506_v42  ;;  %v667_v22 = vld [vmem:[#allocation6 + $0xc68] sm:$0xff]  ;;  %v666_v25 = vld [vmem:[#allocation6 + $0xc60] sm:$0xff]  ;;  %v396_v41 = vld [vmem:[#allocation6 + $0x3f0] sm:$0xff] }
  0xdf   :  { %1174 = vmatpush2.msra.mxu1 %v762_v43  ;;  %1104 = vmatprep.subr.mxu0 %v499_v44  ;;  %v403_v26 = vld [vmem:[#allocation6 + $0x428] sm:$0xff]  ;;  %v402_v33 = vld [vmem:[#allocation6 + $0x420] sm:$0xff]  ;;  %v652_v42 = vld [vmem:[#allocation6 + $0xbf0] sm:$0xff] }
  0xe0   :  { %1175 = vmatprep.subr.mxu1 %v755_v45  ;;  %1105 = vmatpush2.msra.mxu0 %v498_v46  ;;  %v659_v27 = vld [vmem:[#allocation6 + $0xc28] sm:$0xff]  ;;  %v658_v34 = vld [vmem:[#allocation6 + $0xc20] sm:$0xff]  ;;  %v2014_v44 = vld [vmem:[#allocation11 + $0x30] sm:$0xff] }
  0xe1   :  { %1176 = vmatpush2.msra.mxu1 %v754_v47  ;;  %1106 = vmatprep.subr.mxu0 %v491_v48  ;;  %v2008_v40 = vld [vmem:[#allocation11 + $0x38] sm:$0xff]  ;;  %v2011_v43 = vld [vmem:[#allocation11 + $0x20] sm:$0xff]  ;;  %v389_v45 = vld [vmem:[#allocation6 + $0x3b8] sm:$0xff]  ;;  %v133_v48 = vrot.slane %v2002_v36, %v2006_v39 }
  0xe2   :  { %1177 = vmatprep.subr.mxu1 %v747_v49  ;;  %1107 = vmatpush2.msra.mxu0 %v490_v50  ;;  %v645_v46 = vld [vmem:[#allocation6 + $0xbb8] sm:$0xff]  ;;  %v129_v47 = vrot.slane %v2011_v43, %v2006_v39  ;;  %v137_v49 = vrot.slane %v2014_v44, %v2006_v39  ;;  %v388_v50 = vld [vmem:[#allocation6 + $0x3b0] sm:$0xff] }
  0xe3   :  { %1178 = vmatpush2.msra.mxu1 %v746_v30  ;;  %1108 = vmatprep.subr.mxu0 %v483_v28  ;;  %v644_v30 = vld [vmem:[#allocation6 + $0xbb0] sm:$0xff]  ;;  %v141_v28 = vrot.slane %v2008_v40, %v2006_v39  ;;  %143 = vst [vmem:[#allocation11 + $0x88] sm:$0xff] %v133_v48  ;;  %v549_v48 = vld [vmem:[#allocation6 + $0x8b8] sm:$0xff] }
  0xe4   :  { %1179 = vmatprep.subr.mxu1 %v739_v51  ;;  %1109 = vmatpush2.msra.mxu0 %v482_v52  ;;  %v2026_v51 = vsub.s32 3, %v1978_v23  ;;  %v381_v52 = vld [vmem:[#allocation6 + $0x378] sm:$0xff]  ;;  %142 = vst [vmem:[#allocation11 + $0x80] sm:$0xff] %v129_v47  ;;  %144 = vst [vmem:[#allocation11 + $0x90] sm:$0xff] %v137_v49  ;;  %v292_v49 = vld [vmem:[#allocation6 + $0xb0] sm:$0xff] }
  0xe5   :  { %1180 = vmatpush2.msra.mxu1 %v738_v31  ;;  %1110 = vmatprep.subr.mxu0 %v475_v29  ;;  %v637_v31 = vld [vmem:[#allocation6 + $0xb78] sm:$0xff]  ;;  %v380_v29 = vld [vmem:[#allocation6 + $0x370] sm:$0xff]  ;;  %145 = vst [vmem:[#allocation11 + $0x98] sm:$0xff] %v141_v28 }
  0xe6   :  { %1181 = vmatprep.subr.mxu1 %v731_v53  ;;  %1111 = vmatpush2.msra.mxu0 %v474_v54  ;;  %v636_v53 = vld [vmem:[#allocation6 + $0xb70] sm:$0xff]  ;;  %v153_v54 = vrot.slane %v2011_v43, %v2026_v51  ;;  %v293_v47 = vld [vmem:[#allocation6 + $0xb8] sm:$0xff] }
  0xe7   :  { %1182 = vmatpush2.msra.mxu1 %v730_v55  ;;  %1112 = vmatprep.subr.mxu0 %v467_v56  ;;  %v157_v55 = vrot.slane %v2002_v36, %v2026_v51  ;;  %v161_v56 = vrot.slane %v2014_v44, %v2026_v51  ;;  %v541_v28 = vld [vmem:[#allocation6 + $0x878] sm:$0xff] }
  0xe8   :  { %1183 = vmatprep.subr.mxu1 %v723_v57  ;;  %1113 = vmatpush2.msra.mxu0 %v466_v58  ;;  %v373_v57 = vld [vmem:[#allocation6 + $0x338] sm:$0xff]  ;;  %166 = vst [vmem:[#allocation11 + $0xc0] sm:$0xff] %v153_v54  ;;  %v276_v54 = vld [vmem:[#allocation6 + $0x30] sm:$0xff] }
  0xe9   :  { %1184 = vmatpush2.msra.mxu1 %v722_v59  ;;  %1114 = vmatprep.subr.mxu0 %v459_v60  ;;  %v629_v58 = vld [vmem:[#allocation6 + $0xb38] sm:$0xff]  ;;  %v165_v59 = vrot.slane %v2008_v40, %v2026_v51  ;;  %v372_v60 = vld [vmem:[#allocation6 + $0x330] sm:$0xff]  ;;  %167 = vst [vmem:[#allocation11 + $0xc8] sm:$0xff] %v157_v55  ;;  %168 = vst [vmem:[#allocation11 + $0xd0] sm:$0xff] %v161_v56 }
  0xea   :  { %1185 = vmatprep.subr.mxu1 %v715_v61  ;;  %1115 = vmatpush2.msra.mxu0 %v458_v62  ;;  %v628_v61 = vld [vmem:[#allocation6 + $0xb30] sm:$0xff]  ;;  %v365_v62 = vld [vmem:[#allocation6 + $0x2f8] sm:$0xff] }
  0xeb   :  { %1186 = vmatpush2.msra.mxu1 %v714_v63  ;;  %1116 = vmatprep.subr.mxu0 %v451_v0  ;;  %v621_v63 = vld [vmem:[#allocation6 + $0xaf8] sm:$0xff]  ;;  %169 = vst [vmem:[#allocation11 + $0xd8] sm:$0xff] %v165_v59  ;;  %v364_v0 = vld [vmem:[#allocation6 + $0x2f0] sm:$0xff] }
  0xec   :  { %1187 = vmatprep.subr.mxu1 %v707_v1  ;;  %1117 = vmatpush2.msra.mxu0 %v450_v2  ;;  %v620_v1 = vld [vmem:[#allocation6 + $0xaf0] sm:$0xff]  ;;  %v357_v2 = vld [vmem:[#allocation6 + $0x2b8] sm:$0xff] }
  0xed   :  { %1188 = vmatpush2.msra.mxu1 %v706_v3  ;;  %1118 = vmatprep.subr.mxu0 %v443_v4  ;;  %v613_v3 = vld [vmem:[#allocation6 + $0xab8] sm:$0xff]  ;;  %v356_v4 = vld [vmem:[#allocation6 + $0x2b0] sm:$0xff] }
  0xee   :  { %1189 = vmatprep.subr.mxu1 %v699_v5  ;;  %1119 = vmatpush2.msra.mxu0 %v442_v6  ;;  %v612_v5 = vld [vmem:[#allocation6 + $0xab0] sm:$0xff]  ;;  %v349_v6 = vld [vmem:[#allocation6 + $0x278] sm:$0xff] }
  0xef   :  { %1190 = vmatpush2.msra.mxu1 %v698_v7  ;;  %1120 = vmatprep.subr.mxu0 %v435_v8  ;;  %v605_v7 = vld [vmem:[#allocation6 + $0xa78] sm:$0xff]  ;;  %v348_v8 = vld [vmem:[#allocation6 + $0x270] sm:$0xff] }
  0xf0   :  { %1191 = vmatprep.subr.mxu1 %v691_v9  ;;  %1121 = vmatpush2.msra.mxu0 %v434_v10  ;;  %v604_v9 = vld [vmem:[#allocation6 + $0xa70] sm:$0xff]  ;;  %v341_v10 = vld [vmem:[#allocation6 + $0x238] sm:$0xff] }
  0xf1   :  { %1192 = vmatpush2.msra.mxu1 %v690_v11  ;;  %1122 = vmatprep.subr.mxu0 %v427_v12  ;;  %v597_v11 = vld [vmem:[#allocation6 + $0xa38] sm:$0xff]  ;;  %v340_v12 = vld [vmem:[#allocation6 + $0x230] sm:$0xff] }
  0xf2   :  { %1193 = vmatprep.subr.mxu1 %v683_v13  ;;  %1123 = vmatpush2.msra.mxu0 %v426_v14  ;;  %v596_v13 = vld [vmem:[#allocation6 + $0xa30] sm:$0xff]  ;;  %v333_v14 = vld [vmem:[#allocation6 + $0x1f8] sm:$0xff] }
  0xf3   :  { %1194 = vmatpush2.msra.mxu1 %v682_v15  ;;  %1124 = vmatprep.subr.mxu0 %v419_v16  ;;  %v589_v15 = vld [vmem:[#allocation6 + $0x9f8] sm:$0xff]  ;;  %v332_v16 = vld [vmem:[#allocation6 + $0x1f0] sm:$0xff] }
  0xf4   :  { %1195 = vmatprep.subr.mxu1 %v675_v17  ;;  %1125 = vmatpush2.msra.mxu0 %v418_v19  ;;  %v588_v17 = vld [vmem:[#allocation6 + $0x9f0] sm:$0xff]  ;;  %v325_v19 = vld [vmem:[#allocation6 + $0x1b8] sm:$0xff] }
  0xf5   :  { %1196 = vmatpush2.msra.mxu1 %v674_v20  ;;  %1126 = vmatprep.subr.mxu0 %v411_v21  ;;  %v581_v20 = vld [vmem:[#allocation6 + $0x9b8] sm:$0xff]  ;;  %v324_v21 = vld [vmem:[#allocation6 + $0x1b0] sm:$0xff] }
  0xf6   :  { %1197 = vmatprep.subr.mxu1 %v667_v22  ;;  %1127 = vmatpush2.msra.mxu0 %v410_v24  ;;  %v580_v22 = vld [vmem:[#allocation6 + $0x9b0] sm:$0xff]  ;;  %v317_v24 = vld [vmem:[#allocation6 + $0x178] sm:$0xff] }
  0xf7   :  { %1198 = vmatpush2.msra.mxu1 %v666_v25  ;;  %1128 = vmatprep.subr.mxu0 %v403_v26  ;;  %v573_v25 = vld [vmem:[#allocation6 + $0x978] sm:$0xff]  ;;  %v316_v26 = vld [vmem:[#allocation6 + $0x170] sm:$0xff] }
  0xf8   :  { %1199 = vmatprep.subr.mxu1 %v659_v27  ;;  %1129 = vmatpush2.msra.mxu0 %v402_v33  ;;  %v572_v27 = vld [vmem:[#allocation6 + $0x970] sm:$0xff]  ;;  %v309_v33 = vld [vmem:[#allocation6 + $0x138] sm:$0xff] }
  0xf9   :  { %1130 = vmatprep.mubr.f32.mxu0 %v2002_v36  ;;  %1200 = vmatpush2.msra.mxu1 %v658_v34  ;;  %v565_v34 = vld [vmem:[#allocation6 + $0x938] sm:$0xff]  ;;  %v532_v55 = vld [vmem:[#allocation6 + $0x830] sm:$0xff] }
  0xfa   :  { %1201 = vmatprep.mubr.f32.mxu1 %v2008_v40  ;;  %1131 = vmatmul.mubr.f32.vlgmr.msra.gmra.mxu0 %v2011_v43  ;;  %v525_v56 = vld [vmem:[#allocation6 + $0x7f8] sm:$0xff]  ;;  %v780_v59 = vld [vmem:[#allocation6 + $0xff0] sm:$0xff] }
  0xfb   :  { %1202 = vmatmul.mubr.f32.vlgmr.msra.gmra.mxu1 %v2014_v44  ;;  %1208 = vmatprep.subr.mxu0 %v397_v37  ;;  %v308_v37 = vld [vmem:[#allocation6 + $0x130] sm:$0xff] }
  0xfc   :  { %1279 = vmatprep.subr.mxu1 %v653_v38  ;;  %1209 = vmatpush1.msra.mxu0 %v396_v41  ;;  %v564_v38 = vld [vmem:[#allocation6 + $0x930] sm:$0xff]  ;;  %v301_v41 = vld [vmem:[#allocation6 + $0xf8] sm:$0xff] }
  0xfd   :  { %1280 = vmatpush1.msra.mxu1 %v652_v42  ;;  %1210 = vmatprep.subr.mxu0 %v389_v45  ;;  %v557_v42 = vld [vmem:[#allocation6 + $0x8f8] sm:$0xff]  ;;  %v300_v45 = vld [vmem:[#allocation6 + $0xf0] sm:$0xff] }
  0xfe   :  { %1281 = vmatprep.subr.mxu1 %v645_v46  ;;  %1211 = vmatpush1.msra.mxu0 %v388_v50  ;;  %v556_v46 = vld [vmem:[#allocation6 + $0x8f0] sm:$0xff] }
  0xff   :  { %1282 = vmatpush1.msra.mxu1 %v644_v30  ;;  %1212 = vmatprep.subr.mxu0 %v381_v52  ;;  %v548_v50 = vld [vmem:[#allocation6 + $0x8b0] sm:$0xff]  ;;  %v285_v30 = vld [vmem:[#allocation6 + $0x78] sm:$0xff] }
 0x100   :  { %1283 = vmatprep.subr.mxu1 %v637_v31  ;;  %1213 = vmatpush1.msra.mxu0 %v380_v29  ;;  %v284_v52 = vld [vmem:[#allocation6 + $0x70] sm:$0xff]  ;;  %v277_v29 = vld [vmem:[#allocation6 + $0x38] sm:$0xff] }
 0x101   :  { %1284 = vmatpush1.msra.mxu1 %v636_v53  ;;  %1214 = vmatprep.subr.mxu0 %v373_v57  ;;  %v540_v31 = vld [vmem:[#allocation6 + $0x870] sm:$0xff]  ;;  %v533_v53 = vld [vmem:[#allocation6 + $0x838] sm:$0xff] }
 0x102   :  { %1285 = vmatprep.subr.mxu1 %v629_v58  ;;  %1215 = vmatpush1.msra.mxu0 %v372_v60  ;;  %v781_v57 = vld [vmem:[#allocation6 + $0xff8] sm:$0xff]  ;;  %v524_v58 = vld [vmem:[#allocation6 + $0x7f0] sm:$0xff] }
 0x103   :  { %1286 = vmatpush1.msra.mxu1 %v628_v61  ;;  %1216 = vmatprep.subr.mxu0 %v365_v62  ;;  %v517_v60 = vld [vmem:[#allocation6 + $0x7b8] sm:$0xff]  ;;  %v516_v62 = vld [vmem:[#allocation6 + $0x7b0] sm:$0xff] }
 0x104   :  { %1287 = vmatprep.subr.mxu1 %v621_v63  ;;  %1217 = vmatpush1.msra.mxu0 %v364_v0  ;;  %v773_v61 = vld [vmem:[#allocation6 + $0xfb8] sm:$0xff]  ;;  %v772_v63 = vld [vmem:[#allocation6 + $0xfb0] sm:$0xff] }
 0x105   :  { %1288 = vmatpush1.msra.mxu1 %v620_v1  ;;  %1218 = vmatprep.subr.mxu0 %v357_v2  ;;  %v509_v0 = vld [vmem:[#allocation6 + $0x778] sm:$0xff]  ;;  %v508_v2 = vld [vmem:[#allocation6 + $0x770] sm:$0xff] }
 0x106   :  { %1289 = vmatprep.subr.mxu1 %v613_v3  ;;  %1219 = vmatpush1.msra.mxu0 %v356_v4  ;;  %v765_v1 = vld [vmem:[#allocation6 + $0xf78] sm:$0xff]  ;;  %v764_v3 = vld [vmem:[#allocation6 + $0xf70] sm:$0xff] }
 0x107   :  { %1290 = vmatpush1.msra.mxu1 %v612_v5  ;;  %1220 = vmatprep.subr.mxu0 %v349_v6  ;;  %v501_v4 = vld [vmem:[#allocation6 + $0x738] sm:$0xff]  ;;  %v500_v6 = vld [vmem:[#allocation6 + $0x730] sm:$0xff] }
 0x108   :  { %1291 = vmatprep.subr.mxu1 %v605_v7  ;;  %1221 = vmatpush1.msra.mxu0 %v348_v8  ;;  %v757_v5 = vld [vmem:[#allocation6 + $0xf38] sm:$0xff]  ;;  %v756_v7 = vld [vmem:[#allocation6 + $0xf30] sm:$0xff] }
 0x109   :  { %1292 = vmatpush1.msra.mxu1 %v604_v9  ;;  %1222 = vmatprep.subr.mxu0 %v341_v10  ;;  %v493_v8 = vld [vmem:[#allocation6 + $0x6f8] sm:$0xff]  ;;  %v492_v10 = vld [vmem:[#allocation6 + $0x6f0] sm:$0xff] }
 0x10a   :  { %1293 = vmatprep.subr.mxu1 %v597_v11  ;;  %1223 = vmatpush1.msra.mxu0 %v340_v12  ;;  %v749_v9 = vld [vmem:[#allocation6 + $0xef8] sm:$0xff]  ;;  %v748_v11 = vld [vmem:[#allocation6 + $0xef0] sm:$0xff] }
 0x10b   :  { %1294 = vmatpush1.msra.mxu1 %v596_v13  ;;  %1224 = vmatprep.subr.mxu0 %v333_v14  ;;  %v485_v12 = vld [vmem:[#allocation6 + $0x6b8] sm:$0xff]  ;;  %v484_v14 = vld [vmem:[#allocation6 + $0x6b0] sm:$0xff] }
 0x10c   :  { %1295 = vmatprep.subr.mxu1 %v589_v15  ;;  %1225 = vmatpush1.msra.mxu0 %v332_v16  ;;  %v741_v13 = vld [vmem:[#allocation6 + $0xeb8] sm:$0xff]  ;;  %v740_v15 = vld [vmem:[#allocation6 + $0xeb0] sm:$0xff] }
 0x10d   :  { %1296 = vmatpush1.msra.mxu1 %v588_v17  ;;  %1226 = vmatprep.subr.mxu0 %v325_v19  ;;  %v477_v16 = vld [vmem:[#allocation6 + $0x678] sm:$0xff]  ;;  %v476_v19 = vld [vmem:[#allocation6 + $0x670] sm:$0xff] }
 0x10e   :  { %1297 = vmatprep.subr.mxu1 %v581_v20  ;;  %1227 = vmatpush1.msra.mxu0 %v324_v21  ;;  %v733_v17 = vld [vmem:[#allocation6 + $0xe78] sm:$0xff]  ;;  %v732_v20 = vld [vmem:[#allocation6 + $0xe70] sm:$0xff] }
 0x10f   :  { %1298 = vmatpush1.msra.mxu1 %v580_v22  ;;  %1228 = vmatprep.subr.mxu0 %v317_v24  ;;  %v469_v21 = vld [vmem:[#allocation6 + $0x638] sm:$0xff]  ;;  %v468_v24 = vld [vmem:[#allocation6 + $0x630] sm:$0xff] }
 0x110   :  { %1299 = vmatprep.subr.mxu1 %v573_v25  ;;  %1229 = vmatpush1.msra.mxu0 %v316_v26  ;;  %v725_v22 = vld [vmem:[#allocation6 + $0xe38] sm:$0xff]  ;;  %v724_v25 = vld [vmem:[#allocation6 + $0xe30] sm:$0xff] }
 0x111   :  { %1300 = vmatpush1.msra.mxu1 %v572_v27  ;;  %1230 = vmatprep.subr.mxu0 %v309_v33  ;;  %v461_v26 = vld [vmem:[#allocation6 + $0x5f8] sm:$0xff]  ;;  %v460_v33 = vld [vmem:[#allocation6 + $0x5f0] sm:$0xff] }
 0x112   :  { %1301 = vmatprep.subr.mxu1 %v565_v34  ;;  %1231 = vmatpush1.msra.mxu0 %v308_v37  ;;  %v717_v27 = vld [vmem:[#allocation6 + $0xdf8] sm:$0xff]  ;;  %v716_v34 = vld [vmem:[#allocation6 + $0xdf0] sm:$0xff] }
 0x113   :  { %1302 = vmatpush1.msra.mxu1 %v564_v38  ;;  %1232 = vmatprep.subr.mxu0 %v301_v41  ;;  %v453_v37 = vld [vmem:[#allocation6 + $0x5b8] sm:$0xff]  ;;  %v452_v41 = vld [vmem:[#allocation6 + $0x5b0] sm:$0xff] }
 0x114   :  { %1303 = vmatprep.subr.mxu1 %v557_v42  ;;  %1233 = vmatpush1.msra.mxu0 %v300_v45  ;;  %v709_v38 = vld [vmem:[#allocation6 + $0xdb8] sm:$0xff]  ;;  %v708_v42 = vld [vmem:[#allocation6 + $0xdb0] sm:$0xff] }
 0x115   :  { %1304 = vmatpush1.msra.mxu1 %v556_v46  ;;  %1234 = vmatprep.subr.mxu0 %v293_v47  ;;  %v445_v45 = vld [vmem:[#allocation6 + $0x578] sm:$0xff]  ;;  %v444_v47 = vld [vmem:[#allocation6 + $0x570] sm:$0xff] }
 0x116   :  { %1305 = vmatprep.subr.mxu1 %v549_v48  ;;  %1235 = vmatpush1.msra.mxu0 %v292_v49  ;;  %v701_v46 = vld [vmem:[#allocation6 + $0xd78] sm:$0xff]  ;;  %v700_v48 = vld [vmem:[#allocation6 + $0xd70] sm:$0xff] }
 0x117   :  { %1306 = vmatpush1.msra.mxu1 %v548_v50  ;;  %1236 = vmatprep.subr.mxu0 %v285_v30  ;;  %v437_v49 = vld [vmem:[#allocation6 + $0x538] sm:$0xff]  ;;  %v436_v30 = vld [vmem:[#allocation6 + $0x530] sm:$0xff] }
 0x118   :  { %1307 = vmatprep.subr.mxu1 %v541_v28  ;;  %1237 = vmatpush1.msra.mxu0 %v284_v52  ;;  %v693_v50 = vld [vmem:[#allocation6 + $0xd38] sm:$0xff]  ;;  %v692_v28 = vld [vmem:[#allocation6 + $0xd30] sm:$0xff] }
 0x119   :  { %1308 = vmatpush1.msra.mxu1 %v540_v31  ;;  %1238 = vmatprep.subr.mxu0 %v277_v29  ;;  %v429_v52 = vld [vmem:[#allocation6 + $0x4f8] sm:$0xff]  ;;  %v428_v29 = vld [vmem:[#allocation6 + $0x4f0] sm:$0xff] }
 0x11a   :  { %1309 = vmatprep.subr.mxu1 %v533_v53  ;;  %1239 = vmatpush1.msra.mxu0 %v276_v54  ;;  %v685_v31 = vld [vmem:[#allocation6 + $0xcf8] sm:$0xff]  ;;  %v684_v53 = vld [vmem:[#allocation6 + $0xcf0] sm:$0xff] }
 0x11b   :  { %1310 = vmatpush1.msra.mxu1 %v532_v55  ;;  %1240 = vmatprep.subr.mxu0 %v525_v56  ;;  %v421_v54 = vld [vmem:[#allocation6 + $0x4b8] sm:$0xff]  ;;  %v420_v56 = vld [vmem:[#allocation6 + $0x4b0] sm:$0xff] }
 0x11c   :  { %1311 = vmatprep.subr.mxu1 %v781_v57  ;;  %1241 = vmatpush2.msra.mxu0 %v524_v58  ;;  %v677_v55 = vld [vmem:[#allocation6 + $0xcb8] sm:$0xff]  ;;  %v676_v57 = vld [vmem:[#allocation6 + $0xcb0] sm:$0xff] }
 0x11d   :  { %1312 = vmatpush2.msra.mxu1 %v780_v59  ;;  %1242 = vmatprep.subr.mxu0 %v517_v60  ;;  %v413_v58 = vld [vmem:[#allocation6 + $0x478] sm:$0xff]  ;;  %v412_v60 = vld [vmem:[#allocation6 + $0x470] sm:$0xff] }
 0x11e   :  { %1313 = vmatprep.subr.mxu1 %v773_v61  ;;  %1243 = vmatpush2.msra.mxu0 %v516_v62  ;;  %v669_v59 = vld [vmem:[#allocation6 + $0xc78] sm:$0xff]  ;;  %v668_v61 = vld [vmem:[#allocation6 + $0xc70] sm:$0xff] }
 0x11f   :  { %1314 = vmatpush2.msra.mxu1 %v772_v63  ;;  %1244 = vmatprep.subr.mxu0 %v509_v0  ;;  %v405_v62 = vld [vmem:[#allocation6 + $0x438] sm:$0xff]  ;;  %v404_v0 = vld [vmem:[#allocation6 + $0x430] sm:$0xff] }
 0x120   :  { %1315 = vmatprep.subr.mxu1 %v765_v1  ;;  %1245 = vmatpush2.msra.mxu0 %v508_v2  ;;  %v661_v63 = vld [vmem:[#allocation6 + $0xc38] sm:$0xff]  ;;  %v660_v1 = vld [vmem:[#allocation6 + $0xc30] sm:$0xff]  ;;  %v2041_v2 = vsub.s32 5, %v1978_v23 }
 0x121   :  { %1316 = vmatpush2.msra.mxu1 %v764_v3  ;;  %1246 = vmatprep.subr.mxu0 %v501_v4 }
 0x122   :  { %1317 = vmatprep.subr.mxu1 %v757_v5  ;;  %1247 = vmatpush2.msra.mxu0 %v500_v6  ;;  %v205_v3 = vrot.slane %v2002_v36, %v2041_v2  ;;  %v209_v4 = vrot.slane %v2014_v44, %v2041_v2  ;;  %v213_v5 = vrot.slane %v2008_v40, %v2041_v2  ;;  %v2050_v6 = vsub.s32 4, %v1978_v23 }
 0x123   :  { %1318 = vmatpush2.msra.mxu1 %v756_v7  ;;  %1248 = vmatprep.subr.mxu0 %v493_v8  ;;  %v2053_v7 = vsub.s32 7, %v1978_v23  ;;  %v201_v8 = vrot.slane %v2011_v43, %v2041_v2 }
 0x124   :  { %1319 = vmatprep.subr.mxu1 %v749_v9  ;;  %1249 = vmatpush2.msra.mxu0 %v492_v10  ;;  %215 = vst [vmem:[#allocation11 + $0x148] sm:$0xff] %v205_v3  ;;  %216 = vst [vmem:[#allocation11 + $0x150] sm:$0xff] %v209_v4  ;;  %v181_v9 = vrot.slane %v2002_v36, %v2050_v6  ;;  %v185_v10 = vrot.slane %v2014_v44, %v2050_v6 }
 0x125   :  { %1320 = vmatpush2.msra.mxu1 %v748_v11  ;;  %1250 = vmatprep.subr.mxu0 %v485_v12  ;;  %217 = vst [vmem:[#allocation11 + $0x158] sm:$0xff] %v213_v5  ;;  %v189_v11 = vrot.slane %v2008_v40, %v2050_v6  ;;  %v177_v12 = vrot.slane %v2011_v43, %v2050_v6  ;;  %214 = vst [vmem:[#allocation11 + $0x140] sm:$0xff] %v201_v8 }
 0x126   :  { %1321 = vmatprep.subr.mxu1 %v741_v13  ;;  %1251 = vmatpush2.msra.mxu0 %v484_v14  ;;  %v253_v13 = vrot.slane %v2002_v36, %v2053_v7  ;;  %v257_v14 = vrot.slane %v2014_v44, %v2053_v7  ;;  %191 = vst [vmem:[#allocation11 + $0x108] sm:$0xff] %v181_v9  ;;  %192 = vst [vmem:[#allocation11 + $0x110] sm:$0xff] %v185_v10 }
 0x127   :  { %1322 = vmatpush2.msra.mxu1 %v740_v15  ;;  %1252 = vmatprep.subr.mxu0 %v477_v16  ;;  %v261_v15 = vrot.slane %v2008_v40, %v2053_v7  ;;  %193 = vst [vmem:[#allocation11 + $0x118] sm:$0xff] %v189_v11  ;;  %v2072_v16 = vsub.s32 6, %v1978_v23  ;;  %190 = vst [vmem:[#allocation11 + $0x100] sm:$0xff] %v177_v12 }
 0x128   :  { %1323 = vmatprep.subr.mxu1 %v733_v17  ;;  %1253 = vmatpush2.msra.mxu0 %v476_v19  ;;  %263 = vst [vmem:[#allocation11 + $0x1c8] sm:$0xff] %v253_v13  ;;  %264 = vst [vmem:[#allocation11 + $0x1d0] sm:$0xff] %v257_v14  ;;  %v249_v17 = vrot.slane %v2011_v43, %v2053_v7 }
 0x129   :  { %1324 = vmatpush2.msra.mxu1 %v732_v20  ;;  %1254 = vmatprep.subr.mxu0 %v469_v21  ;;  %265 = vst [vmem:[#allocation11 + $0x1d8] sm:$0xff] %v261_v15  ;;  %v229_v19 = vrot.slane %v2002_v36, %v2072_v16  ;;  %v233_v20 = vrot.slane %v2014_v44, %v2072_v16 }
 0x12a   :  { %1325 = vmatprep.subr.mxu1 %v725_v22  ;;  %1255 = vmatpush2.msra.mxu0 %v468_v24  ;;  %v237_v21 = vrot.slane %v2008_v40, %v2072_v16  ;;  %v225_v22 = vrot.slane %v2011_v43, %v2072_v16  ;;  %262 = vst [vmem:[#allocation11 + $0x1c0] sm:$0xff] %v249_v17 }
 0x12b   :  { %1326 = vmatpush2.msra.mxu1 %v724_v25  ;;  %1256 = vmatprep.subr.mxu0 %v461_v26  ;;  %239 = vst [vmem:[#allocation11 + $0x188] sm:$0xff] %v229_v19  ;;  %240 = vst [vmem:[#allocation11 + $0x190] sm:$0xff] %v233_v20 }
 0x12c   :  { %1327 = vmatprep.subr.mxu1 %v717_v27  ;;  %1257 = vmatpush2.msra.mxu0 %v460_v33  ;;  %241 = vst [vmem:[#allocation11 + $0x198] sm:$0xff] %v237_v21  ;;  %238 = vst [vmem:[#allocation11 + $0x180] sm:$0xff] %v225_v22 }
 0x12d   :  { %1328 = vmatpush2.msra.mxu1 %v716_v34  ;;  %1258 = vmatprep.subr.mxu0 %v453_v37 }
 0x12e   :  { %1329 = vmatprep.subr.mxu1 %v709_v38  ;;  %1259 = vmatpush2.msra.mxu0 %v452_v41  ;;  %v1350_v41 = vld [vmem:[#allocation8] sm:$0xf] }
 0x12f   :  { %1330 = vmatpush2.msra.mxu1 %v708_v42  ;;  %1260 = vmatprep.subr.mxu0 %v445_v45 }
 0x130   :  { %1331 = vmatprep.subr.mxu1 %v701_v46  ;;  %1261 = vmatpush2.msra.mxu0 %v444_v47  ;;  %v1359_v47 = vrot.slane %v1350_v41, %v1984_v35 }
 0x131   :  { %1332 = vmatpush2.msra.mxu1 %v700_v48  ;;  %1262 = vmatprep.subr.mxu0 %v437_v49 }
 0x132   :  { %1333 = vmatprep.subr.mxu1 %v693_v50  ;;  %1263 = vmatpush2.msra.mxu0 %v436_v30  ;;  %v1363_v50 = vrot.slane %v1350_v41, %v2006_v39 }
 0x133   :  { %1334 = vmatpush2.msra.mxu1 %v692_v28  ;;  %1264 = vmatprep.subr.mxu0 %v429_v52  ;;  %v2087_v28 = vld [vmem:[#allocation9] sm:$0xf] }
 0x134   :  { %1335 = vmatprep.subr.mxu1 %v685_v31  ;;  %1265 = vmatpush2.msra.mxu0 %v428_v29  ;;  %v1367_v31 = vrot.slane %v1350_v41, %v2026_v51 }
 0x135   :  { %1336 = vmatpush2.msra.mxu1 %v684_v53  ;;  %1266 = vmatprep.subr.mxu0 %v421_v54  ;;  %v2092_v54 = vrot.slane %v2087_v28, %v1981_v32 }
 0x136   :  { %1337 = vmatprep.subr.mxu1 %v677_v55  ;;  %1267 = vmatpush2.msra.mxu0 %v420_v56  ;;  %v848_v24 = vpop.f32.mrf.mxu0 }
 0x137   :  { %1338 = vmatpush2.msra.mxu1 %v676_v57  ;;  %1268 = vmatprep.subr.mxu0 %v413_v58  ;;  %v919_v25 = vpop.f32.mrf.mxu1  ;;  %v2099_v57 = vrot.slane %v2087_v28, %v1984_v35 }
 0x138   :  { %1339 = vmatprep.subr.mxu1 %v669_v59  ;;  %1269 = vmatpush2.msra.mxu0 %v412_v60  ;;  %v850_v26 = vpop.f32.mrf.mxu0  ;;  %v920_v45 = vadd.f32 %v919_v25, %v848_v24 }
 0x139   :  { %1340 = vmatpush2.msra.mxu1 %v668_v61  ;;  %1270 = vmatprep.subr.mxu0 %v405_v62  ;;  %v921_v27 = vpop.f32.mrf.mxu1 }
 0x13a   :  { %1341 = vmatprep.subr.mxu1 %v661_v63  ;;  %1271 = vmatpush2.msra.mxu0 %v404_v0  ;;  %v922_v46 = vadd.f32 %v921_v27, %v850_v26 }
 0x13b   :  { %1272 = vmatprep.mubr.f32.mxu0 %v2002_v36  ;;  %1342 = vmatpush2.msra.mxu1 %v660_v1  ;;  %v2111_v1 = vrot.slane %v2087_v28, %v2006_v39 }
 0x13c   :  { %1343 = vmatprep.mubr.f32.mxu1 %v2008_v40  ;;  %1273 = vmatmul.mubr.f32.vlgmr.msra.gmra.mxu0 %v2011_v43  ;;  %v1355_v43 = vrot.slane %v1350_v41, %v1981_v32  ;;  %v1373_v53 = vadd.f32 %v1359_v47, %v922_v46 }
 0x13d   :  { %1344 = vmatmul.mubr.f32.vlgmr.msra.gmra.mxu1 %v2014_v44 }
 0x13e   :  { %v1372_v29 = vadd.f32 %v1355_v43, %v920_v45 }
 0x178   :  { %v990_v33 = vpop.f32.mrf.mxu0 }
 0x179   :  { %v1061_v36 = vpop.f32.mrf.mxu1 }
 0x17a   :  { %v992_v34 = vpop.f32.mrf.mxu0  ;;  %v1062_v49 = vadd.f32 %v1061_v36, %v990_v33 }
 0x17b   :  { %v1063_v37 = vpop.f32.mrf.mxu1 }
 0x17c   :  { %v1064_v52 = vadd.f32 %v1063_v37, %v992_v34  ;;  %v2095_v56 = vadd.f32 %v1363_v50, %v1062_v49 }
 0x17e   :  { %v2107_v0 = vadd.f32 %v1367_v31, %v1064_v52 }
 0x1ba   :  { %v1132_v44 = vpop.f32.mrf.mxu0 }
 0x1bb   :  { %v1203_v38 = vpop.f32.mrf.mxu1 }
 0x1bc   :  { %v1134_v40 = vpop.f32.mrf.mxu0  ;;  %v1204_v48 = vadd.f32 %v1203_v38, %v1132_v44 }
 0x1bd   :  { %v1205_v42 = vpop.f32.mrf.mxu1 }
 0x1be   :  { %v1206_v30 = vadd.f32 %v1205_v42, %v1134_v40  ;;  %v1479_v55 = vrot.slane %v1204_v48, %v2006_v39  ;;  %v1385_v60 = vrot.slane %v1204_v48, %v1981_v32  ;;  %v1515_v8 = vrot.slane %v1204_v48, %v2026_v51 }
 0x1bf   :  { %v1443_v9 = vrot.slane %v1204_v48, %v1984_v35  ;;  %v1587_v10 = vrot.slane %v1204_v48, %v2041_v2  ;;  %v1551_v13 = vrot.slane %v1204_v48, %v2050_v6  ;;  %v1659_v14 = vrot.slane %v1204_v48, %v2053_v7 }
 0x1c0   :  { %v1483_v58 = vrot.slane %v1206_v30, %v2006_v39  ;;  %v1389_v59 = vrot.slane %v1206_v30, %v1981_v32  ;;  %v1519_v61 = vrot.slane %v1206_v30, %v2026_v51  ;;  %v1447_v62 = vrot.slane %v1206_v30, %v1984_v35 }
 0x1c1   :  { %v1591_v63 = vrot.slane %v1206_v30, %v2041_v2  ;;  %v1555_v3 = vrot.slane %v1206_v30, %v2050_v6  ;;  %v1663_v4 = vrot.slane %v1206_v30, %v2053_v7  ;;  %v1492_v5 = vadd.f32 %v1479_v55, %v1372_v29 }
 0x1c2   :  { %v1493_v11 = vadd.f32 %v1483_v58, %v1373_v53  ;;  %v1399_v12 = vadd.f32 %v1389_v59, %v1373_v53  ;;  %v1398_v15 = vadd.f32 %v1385_v60, %v1372_v29  ;;  %v1529_v17 = vadd.f32 %v1519_v61, %v1373_v53 }
 0x1c3   :  { %v1457_v19 = vadd.f32 %v1447_v62, %v1373_v53  ;;  %v1601_v20 = vadd.f32 %v1591_v63, %v1373_v53  ;;  %v1565_v21 = vadd.f32 %v1555_v3, %v1373_v53  ;;  %v1673_v22 = vadd.f32 %v1663_v4, %v1373_v53 }
 0x1c4   :  { %v1623_v24 = vrot.slane %v1204_v48, %v2072_v16  ;;  %v1627_v25 = vrot.slane %v1206_v30, %v2072_v16  ;;  %v1496_v26 = vmax.f32 %v1492_v5, 0.0  ;;  %v1528_v27 = vadd.f32 %v1515_v8, %v1372_v29 }
 0x1c5   :  { %v1456_v33 = vadd.f32 %v1443_v9, %v1372_v29  ;;  %v1600_v36 = vadd.f32 %v1587_v10, %v1372_v29  ;;  %v1497_v34 = vmax.f32 %v1493_v11, 0.0  ;;  %v1403_v37 = vmax.f32 %v1399_v12, 0.0 }
 0x1c6   :  { %v1564_v44 = vadd.f32 %v1551_v13, %v1372_v29  ;;  %v1672_v38 = vadd.f32 %v1659_v14, %v1372_v29  ;;  %v1402_v41 = vmax.f32 %v1398_v15, 0.0  ;;  %v1533_v40 = vmax.f32 %v1529_v17, 0.0 }
 0x1c7   :  { %v1461_v42 = vmax.f32 %v1457_v19, 0.0  ;;  %v1605_v43 = vmax.f32 %v1601_v20, 0.0  ;;  %v1569_v45 = vmax.f32 %v1565_v21, 0.0  ;;  %v1677_v46 = vmax.f32 %v1673_v22, 0.0 }
 0x1c8   :  { %v1636_v47 = vadd.f32 %v1623_v24, %v1372_v29  ;;  %v1637_v49 = vadd.f32 %v1627_v25, %v1373_v53  ;;  %v1500_v48 = vmul.f32 %v1496_v26, %v2092_v54  ;;  %v1532_v50 = vmax.f32 %v1528_v27, 0.0 }
 0x1c9   :  { %v1460_v30 = vmax.f32 %v1456_v33, 0.0  ;;  %v1604_v52 = vmax.f32 %v1600_v36, 0.0  ;;  %v1501_v31 = vmul.f32 %v1497_v34, %v2099_v57  ;;  %v1428_v55 = vmul.f32 %v2099_v57, %v1403_v37 }
 0x1ca   :  { %v1568_v58 = vmax.f32 %v1564_v44, 0.0  ;;  %v1676_v59 = vmax.f32 %v1672_v38, 0.0  ;;  %v1427_v60 = vmul.f32 %v2092_v54, %v1402_v41  ;;  %v1537_v61 = vmul.f32 %v1533_v40, %v2099_v57 }
 0x1cb   :  { %v1465_v62 = vmul.f32 %v1461_v42, %v2099_v57  ;;  %v1609_v29 = vmul.f32 %v1605_v43, %v2099_v57  ;;  %v1573_v53 = vmul.f32 %v1569_v45, %v2099_v57  ;;  %v1681_v63 = vmul.f32 %v1677_v46, %v2099_v57 }
 0x1cc   :  { %v1640_v3 = vmax.f32 %v1636_v47, 0.0  ;;  %v1641_v4 = vmax.f32 %v1637_v49, 0.0  ;;  %v2133_v5 = vrot.slane %v2087_v28, %v2026_v51  ;;  %v1536_v8 = vmul.f32 %v1532_v50, %v2092_v54 }
 0x1cd   :  { %v1464_v9 = vmul.f32 %v1460_v30, %v2092_v54  ;;  %v1608_v10 = vmul.f32 %v1604_v52, %v2092_v54  ;;  %v1504_v13 = vadd.f32 %v1501_v31, %v1500_v48  ;;  %v1431_v14 = vadd.f32 %v1428_v55, %v1427_v60 }
 0x1ce   :  { %v1572_v15 = vmul.f32 %v1568_v58, %v2092_v54  ;;  %v1680_v17 = vmul.f32 %v1676_v59, %v2092_v54  ;;  %v1540_v20 = vadd.f32 %v1537_v61, %v1536_v8  ;;  %v2149_v27 = vmul.f32 %v1640_v3, %v2092_v54 }
 0x1cf   :  { %v1468_v21 = vadd.f32 %v1465_v62, %v1464_v9  ;;  %v2142_v28 = vadd.f32 %v1609_v29, %v1608_v10  ;;  %v2152_v33 = vmul.f32 %v1641_v4, %v2099_v57 }
 0x1d0   :  { %v2144_v25 = vadd.f32 %v1573_v53, %v1572_v15  ;;  %v2146_v26 = vadd.f32 %v1681_v63, %v1680_v17 }
 0x1fc   :  { %v1274_v11 = vpop.f32.mrf.mxu0 }
 0x1fd   :  { %v1345_v12 = vpop.f32.mrf.mxu1 }
 0x1fe   :  { %v2140_v19 = vadd.f32 %v1345_v12, %v1274_v11  ;;  %v1276_v22 = vpop.f32.mrf.mxu0 }
 0x1ff   :  { %v1347_v24 = vpop.f32.mrf.mxu1 }
 0x200   :  { %v2154_v36 = vadd.f32 %v1347_v24, %v1276_v22  ;;  %v1487_v34 = vrot.slane %v2140_v19, %v2006_v39  ;;  %v1393_v37 = vrot.slane %v2140_v19, %v1981_v32  ;;  %v1523_v44 = vrot.slane %v2140_v19, %v2026_v51 }
 0x201   :  { %v1451_v38 = vrot.slane %v2140_v19, %v1984_v35  ;;  %v1595_v54 = vrot.slane %v2140_v19, %v2041_v2  ;;  %v1559_v57 = vrot.slane %v2140_v19, %v2050_v6  ;;  %v1667_v41 = vrot.slane %v2140_v19, %v2053_v7 }
 0x202   :  { %v1491_v40 = vrot.slane %v2154_v36, %v2006_v39  ;;  %v1494_v42 = vadd.f32 %v1487_v34, %v2095_v56  ;;  %v1397_v43 = vrot.slane %v2154_v36, %v1981_v32  ;;  %v1400_v45 = vadd.f32 %v1393_v37, %v2095_v56 }
 0x203   :  { %v1527_v46 = vrot.slane %v2154_v36, %v2026_v51  ;;  %v1530_v47 = vadd.f32 %v1523_v44, %v2095_v56  ;;  %v1455_v49 = vrot.slane %v2154_v36, %v1984_v35  ;;  %v1458_v48 = vadd.f32 %v1451_v38, %v2095_v56 }
 0x204   :  { %v1495_v50 = vadd.f32 %v1491_v40, %v2107_v0  ;;  %v1498_v39 = vmax.f32 %v1494_v42, 0.0  ;;  %v1401_v30 = vadd.f32 %v1397_v43, %v2107_v0  ;;  %v1404_v52 = vmax.f32 %v1400_v45, 0.0 }
 0x205   :  { %v1531_v32 = vadd.f32 %v1527_v46, %v2107_v0  ;;  %v1534_v31 = vmax.f32 %v1530_v47, 0.0  ;;  %v1459_v55 = vadd.f32 %v1455_v49, %v2107_v0  ;;  %v1462_v58 = vmax.f32 %v1458_v48, 0.0 }
 0x206   :  { %v1499_v51 = vmax.f32 %v1495_v50, 0.0  ;;  %v1502_v59 = vmul.f32 %v1498_v39, %v2111_v1  ;;  %v1405_v60 = vmax.f32 %v1401_v30, 0.0  ;;  %v1429_v35 = vmul.f32 %v2111_v1, %v1404_v52 }
 0x207   :  { %v1535_v61 = vmax.f32 %v1531_v32, 0.0  ;;  %v1538_v62 = vmul.f32 %v1534_v31, %v2111_v1  ;;  %v1463_v29 = vmax.f32 %v1459_v55, 0.0  ;;  %v1466_v53 = vmul.f32 %v1462_v58, %v2111_v1 }
 0x208   :  { %v1503_v63 = vmul.f32 %v1499_v51, %v2133_v5  ;;  %v1505_v3 = vadd.f32 %v1504_v13, %v1502_v59  ;;  %v1430_v4 = vmul.f32 %v2133_v5, %v1405_v60  ;;  %v1432_v8 = vadd.f32 %v1431_v14, %v1429_v35 }
 0x209   :  { %v1539_v9 = vmul.f32 %v1535_v61, %v2133_v5  ;;  %v1541_v10 = vadd.f32 %v1540_v20, %v1538_v62  ;;  %v1467_v11 = vmul.f32 %v1463_v29, %v2133_v5  ;;  %v1469_v12 = vadd.f32 %v1468_v21, %v1466_v53 }
 0x20a   :  { %v1506_v15 = vadd.f32 %v1505_v3, %v1503_v63  ;;  %v1433_v17 = vadd.f32 %v1432_v8, %v1430_v4  ;;  %v1599_v22 = vrot.slane %v2154_v36, %v2041_v2  ;;  %v1602_v24 = vadd.f32 %v1595_v54, %v2095_v56 }
 0x20b   :  { %v1542_v34 = vadd.f32 %v1541_v10, %v1539_v9  ;;  %v1470_v37 = vadd.f32 %v1469_v12, %v1467_v11  ;;  %v1563_v13 = vrot.slane %v2154_v36, %v2050_v6  ;;  %v1566_v14 = vadd.f32 %v1559_v57, %v2095_v56 }
 0x20c   :  { %1507 = vadd.xlane.f32.xlu1 %v1506_v15  ;;  %1434 = vadd.xlane.f32.xlu0 %v1433_v17  ;;  %v1603_v20 = vadd.f32 %v1599_v22, %v2107_v0  ;;  %v1606_v44 = vmax.f32 %v1602_v24, 0.0  ;;  %v1671_v21 = vrot.slane %v2154_v36, %v2053_v7  ;;  %v1674_v38 = vadd.f32 %v1667_v41, %v2095_v56 }
 0x20d   :  { %v1567_v2 = vadd.f32 %v1563_v13, %v2107_v0  ;;  %v1570_v54 = vmax.f32 %v1566_v14, 0.0  ;;  %v1631_v40 = vrot.slane %v2140_v19, %v2072_v16  ;;  %v1635_v6 = vrot.slane %v2154_v36, %v2072_v16 }
 0x20e   :  { %v1607_v57 = vmax.f32 %v1603_v20, 0.0  ;;  %v1610_v42 = vmul.f32 %v1606_v44, %v2111_v1  ;;  %v1675_v43 = vadd.f32 %v1671_v21, %v2107_v0  ;;  %v1678_v45 = vmax.f32 %v1674_v38, 0.0 }
 0x20f   :  { %v1571_v46 = vmax.f32 %v1567_v2, 0.0  ;;  %v1574_v7 = vmul.f32 %v1570_v54, %v2111_v1  ;;  %v1638_v41 = vadd.f32 %v1631_v40, %v2095_v56  ;;  %v1639_v47 = vadd.f32 %v1635_v6, %v2107_v0 }
 0x210   :  { %1543 = vadd.xlane.f32.xlu1 %v1542_v34  ;;  %1471 = vadd.xlane.f32.xlu0 %v1470_v37  ;;  %v1611_v19 = vmul.f32 %v1607_v57, %v2133_v5  ;;  %v1613_v49 = vadd.f32 %v2142_v28, %v1610_v42  ;;  %v1679_v16 = vmax.f32 %v1675_v43, 0.0  ;;  %v1682_v36 = vmul.f32 %v1678_v45, %v2111_v1 }
 0x211   :  { %v1575_v48 = vmul.f32 %v1571_v46, %v2133_v5  ;;  %v1577_v50 = vadd.f32 %v2144_v25, %v1574_v7  ;;  %v1642_v39 = vmax.f32 %v1638_v41, 0.0  ;;  %v1643_v30 = vmax.f32 %v1639_v47, 0.0 }
 0x212   :  { %v1614_v52 = vadd.f32 %v1613_v49, %v1611_v19  ;;  %v1683_v56 = vmul.f32 %v1679_v16, %v2133_v5  ;;  %v1685_v0 = vadd.f32 %v2146_v26, %v1682_v36  ;;  %v1648_v28 = vadd.f32 %v2152_v33, %v2149_v27 }
 0x213   :  { %v1578_v32 = vadd.f32 %v1577_v50, %v1575_v48  ;;  %v1646_v31 = vmul.f32 %v1642_v39, %v2111_v1  ;;  %v1647_v55 = vmul.f32 %v1643_v30, %v2133_v5 }
 0x214   :  { %1615 = vadd.xlane.f32.xlu1 %v1614_v52  ;;  %v1686_v51 = vadd.f32 %v1685_v0, %v1683_v56 }
 0x215   :  { %1579 = vadd.xlane.f32.xlu0 %v1578_v32  ;;  %v1649_v58 = vadd.f32 %v1648_v28, %v1646_v31 }
 0x217   :  { %v1650_v25 = vadd.f32 %v1649_v58, %v1647_v55 }
 0x218   :  { %1687 = vadd.xlane.f32.xlu1 %v1686_v51 }
 0x219   :  { %1651 = vadd.xlane.f32.xlu0 %v1650_v25 }
 0x21a   :  { %1832 = shalt.err (!%p1829_p10)
}
 0x21b   :  { %1707 = dma.vmem_to_hbm [thread:$0]  %s1702_s3, 8192, %s2244_s5, [#allocation5], %s1872_s24, %s1872_s24, %s1873_s25   ;;  %v1381_v5 = vand.u32 127, %v78_v18  ;;  %vm1694_vm9 = vcmask 64512  }
 0x21c   :  { %v1436_v1 = vstv %s2243_s4  ;;  %s1878_s4 = smov [#allocation12]  }
 0x21d   :  { %vm1438_vm0 = vcmp.eq.s32.totalorder %v1381_v5, 0  ;;  %vm1474_vm1 = vcmp.eq.s32.totalorder %v1381_v5, 1  ;;  %vm1510_vm2 = vcmp.eq.s32.totalorder %v1381_v5, 2  ;;  %vm1546_vm3 = vcmp.eq.s32.totalorder %v1381_v5, 3  ;;  %s1714_s5 = sshll.u32 %s1878_s4, 4  ;;  %s1715_s5 = int_to_ptr.vmem [resolvable:$true] %s1714_s5 }
 0x21e   :  { %vm1582_vm4 = vcmp.eq.s32.totalorder %v1381_v5, 4  ;;  %vm1618_vm5 = vcmp.eq.s32.totalorder %v1381_v5, 5  ;;  %vm1654_vm6 = vcmp.eq.s32.totalorder %v1381_v5, 6  ;;  %vm1690_vm7 = vcmp.eq.s32.totalorder %v1381_v5, 7  ;;  %s1841_s22 = scalar_lea.vmem %s1715_s5, 128  ;;  %p1846_p12 = scmp.lt.s32.totalorder %s1715_s5, %s1715_s5 }
 0x21f   :  { %vm1692_vm8 = vcmp.eq.s32.totalorder %v1978_v23, %v1381_v5  ;;  %p1842_p11 = scmp.ne.s32.totalorder %s1715_s5, %s1841_s22  ;;  %p1847_p13 = scmp.lt.s32.totalorder %s1841_s22, %s1841_s22 }
 0x221   :  { %p1848_p0 = por %p1847_p13, %p1846_p12 }
 0x223   :  { %p1849_p1 = pnand %p1848_p0, %p1842_p11 }
 0x295   :  { %v1508_v26 = vpop.xlane.xlu1 %1507  ;;  %v1435_v27 = vpop.xlane.xlu0 %1434 }
 0x296   :  { %v1437_v33 = vadd.f32 %v1436_v1, %v1435_v27  ;;  %v1509_v61 = vadd.f32 %v1508_v26, %v1436_v1 }
 0x298   :  { %v1439_v62 = vsel %vm1438_vm0, %v1437_v33, 0.0 }
 0x299   :  { %v1544_v59 = vpop.xlane.xlu1 %1543  ;;  %v1472_v60 = vpop.xlane.xlu0 %1471 }
 0x29a   :  { %v1473_v35 = vadd.f32 %v1472_v60, %v1436_v1  ;;  %v1545_v29 = vadd.f32 %v1544_v59, %v1436_v1 }
 0x29c   :  { %v1475_v53 = vsel %vm1474_vm1, %v1473_v35, %v1439_v62 }
 0x29d   :  { %v1511_v63 = vsel %vm1510_vm2, %v1509_v61, %v1475_v53  ;;  %v1616_v3 = vpop.xlane.xlu1 %1615 }
 0x29e   :  { %v1547_v4 = vsel %vm1546_vm3, %v1545_v29, %v1511_v63  ;;  %v1580_v8 = vpop.xlane.xlu0 %1579  ;;  %v1617_v9 = vadd.f32 %v1616_v3, %v1436_v1 }
 0x29f   :  { %v1581_v18 = vadd.f32 %v1580_v8, %v1436_v1 }
 0x2a1   :  { %v1583_v10 = vsel %vm1582_vm4, %v1581_v18, %v1547_v4  ;;  %v1688_v11 = vpop.xlane.xlu1 %1687 }
 0x2a2   :  { %v1689_v12 = vadd.f32 %v1688_v11, %v1436_v1  ;;  %v1652_v15 = vpop.xlane.xlu0 %1651  ;;  %v1619_v22 = vsel %vm1618_vm5, %v1617_v9, %v1583_v10 }
 0x2a3   :  { %v1653_v17 = vadd.f32 %v1652_v15, %v1436_v1 }
 0x2a5   :  { %v1655_v24 = vsel %vm1654_vm6, %v1653_v17, %v1619_v22 }
 0x2a6   :  { %v1691_v34 = vsel %vm1690_vm7, %v1689_v12, %v1655_v24 }
 0x2a7   :  { %v1693_v37 = vsel %vm1692_vm8, 1.0, %v1691_v34 }
 0x2a8   :  { %1695 = vst.msk [vmem:[#allocation12] sm:$0xff] %vm1694_vm9, %v1693_v37 }
 0x2a9   :  { %1852 = shalt.err (!%p1849_p1)
}
 0x2aa   :  { %1717 = dma.vmem_to_hbm [thread:$0]  %s1715_s5, 128, %s2245_s6, [#allocation13]  }
 0x2ab   :  { %1867 = dma.done.wait [#allocation5], 8192  }
 0x2ac   :  { %1868 = vsyncadd [#allocation5], 4294959104 }
 0x2ad   :  { %1869 = dma.done.wait [#allocation13], 128  }
 0x2ae   :  { %1870 = vsyncadd [#allocation13], 4294967168 }
 0x2af   :  { %1724 = vsyncpa [#allocation4], 1 }
 0x2b0   :  { %1725 = vsyncpa [#allocation7], 1 }
 0x2b1   :  { %1726 = vsyncpa [#allocation10], 1 }
 0x2b2   :  { %1727 = vsyncpa [#allocation5], 1 }
 0x2b3   :  { %1728 = vsyncpa [#allocation13], 1 }

</bundles_post_ra>
